<compile_context>
chip_gen: v6e
topology: v6e:2x2x1
jax: 0.10.0
libtpu: 0.0.40
codegen_flags: <defaults>
</compile_context>

<pallas_src>
import numpy as np
import jax
import jax.numpy as jnp
from jax import lax
from jax.experimental import pallas as pl
from jax.experimental.pallas import tpu as pltpu


def _swish(x):
    return x * jax.nn.sigmoid(x)


def _num_tensorcores():
    """Best-effort TensorCores-per-chip (2 on v7x-class parts, else 1).  Falls back to
    1, which collapses the whole batch into a single block (the right thing on
    v5e/v6e)."""
    try:
        info = pltpu.get_tpu_info()
        for attr in ("num_cores", "core_count", "num_tensorcores", "tensorcore_count"):
            v = getattr(info, attr, None)
            if isinstance(v, (int, np.integer)) and 1 <= int(v) <= 8:
                return int(v)
    except Exception:
        pass
    try:
        d = jax.devices()[0]
        for attr in ("num_cores", "core_count"):
            v = getattr(d, attr, None)
            if isinstance(v, (int, np.integer)) and 1 <= int(v) <= 8:
                return int(v)
    except Exception:
        pass
    return 1


# ----------------------------------------------------------------------------
# Fused kernel: expansion + mixed depthwise + SE + pointwise + residual
# ----------------------------------------------------------------------------
def _make_fused_kernel(Nb, H, Hp, Whid, K, dilate, pad,
                       use_expand, use_se, use_residual, reduced):
    def kernel(*refs):
        it = iter(refs)
        x_ref = next(it)
        if use_expand:
            wexp_ref, bexp_ref = next(it), next(it)
        tdw_ref, bdw_ref = next(it), next(it)
        if use_se:
            sew1_ref, seb1_ref, sew2_ref, seb2_ref = (next(it), next(it),
                                                      next(it), next(it))
        wpw_ref, bpw_ref = next(it), next(it)
        o_ref, hpad_ref = next(it), next(it)

        x = x_ref[...]                                         # (Nb*H, W*Cin) f32

        # 1) expansion: grouped 1x1 conv (BN1 scale folded) + swish; bf16 MXU operands
        if use_expand:
            h = jnp.dot(x.astype(jnp.bfloat16), wexp_ref[...],
                        preferred_element_type=jnp.float32) + bexp_ref[...]
            h = _swish(h)
        else:
            h = x                                              # hidden == Cin

        # 2)+3) mixed depthwise conv + BN2 scale as ONE fused MXU contraction over an
        # im2col of the K H-shifted slices.  Only H needs real padding (the W zero
        # padding and per-group kernel support live in tdw's band structure).  Pad rows
        # are rewritten every step: a pid==0 gate would be wrong under megacore
        # partitioning (core 1's scratch would never be zeroed) and the cost is tiny.
        if pad:
            zrow = jnp.zeros((pad, Whid), jnp.float32)
        rows = []
        for n in range(Nb):
            hn = h[n * H:(n + 1) * H, :]                       # (H, Whid)
            base = n * Hp
            if pad:
                hpad_ref[base:base + pad, :] = zrow
                hpad_ref[base + pad + H:base + Hp, :] = zrow
            hpad_ref[base + pad:base + pad + H, :] = hn
            taps = []
            for dy in range(K):
                off = dy * dilate
                if off == pad:
                    taps.append(hn)                            # center tap from vregs
                else:
                    taps.append(hpad_ref[base + off:base + off + H, :])
            rows.append(jnp.concatenate(taps, axis=-1))        # (H, K*Whid)
        im2col = jnp.concatenate(rows, axis=0) if Nb > 1 else rows[0]
        acc = jnp.dot(im2col.astype(jnp.bfloat16), tdw_ref[...],
                      preferred_element_type=jnp.float32)      # (Nb*H, Whid)
        d = _swish(acc + bdw_ref[...])

        # 4) squeeze-excite entirely on VPU/XLU (fc1/fc2 are M=1, N/K=reduced -- far too
        # degenerate for the MXU).  The /W of the avg-pool and the gate replication over
        # W are folded into sew1 / sew2 host-side; the fc1 bias comes from SMEM scalars.
        if use_se:
            w1 = sew1_ref[...]                                 # (reduced, Whid)
            w2 = sew2_ref[...]                                 # (reduced, Whid)
            b2v = seb2_ref[...]                                # (1, Whid)
            parts = []
            for n in range(Nb):
                dn = d[n * H:(n + 1) * H, :]
                pooled = jnp.mean(dn, axis=0, keepdims=True)   # (1, Whid)
                gate_pre = b2v
                for r in range(reduced):
                    s_r = (jnp.sum(pooled * w1[r:r + 1, :], axis=1, keepdims=True)
                           + seb1_ref[r])                      # (1, 1)
                    s_r = _swish(s_r)
                    gate_pre = gate_pre + s_r * w2[r:r + 1, :]
                parts.append(dn * jax.nn.sigmoid(gate_pre))
            d = jnp.concatenate(parts, axis=0) if Nb > 1 else parts[0]

        # 5) pointwise grouped 1x1 conv + BN3 (scale folded) (+ residual)
        out = jnp.dot(d.astype(jnp.bfloat16), wpw_ref[...],
                      preferred_element_type=jnp.float32) + bpw_ref[...]
        if use_residual:
            out = out + x
        o_ref[...] = out.astype(o_ref.dtype)
    return kernel


# ----------------------------------------------------------------------------
# Host-side weight preparation (runs once; pure numpy)
# ----------------------------------------------------------------------------
def _fold_bn(bn, eps=1e-3):
    gamma = np.asarray(bn["gamma"], np.float32)
    beta = np.asarray(bn["beta"], np.float32)
    mean = np.asarray(bn["mean"], np.float32)
    var = np.asarray(bn["var"], np.float32)
    scale = gamma / np.sqrt(var + eps)
    bias = beta - mean * scale
    return scale, bias


def _block_diag(mats):
    mats = [np.asarray(m, np.float32) for m in mats]
    r = sum(m.shape[0] for m in mats)
    c = sum(m.shape[1] for m in mats)
    out = np.zeros((r, c), np.float32)
    ri = ci = 0
    for m in mats:
        out[ri:ri + m.shape[0], ci:ci + m.shape[1]] = m
        ri += m.shape[0]
        ci += m.shape[1]
    return out


def _combined_dw(dw_list, kernel_sizes, hidden):
    """Fold the per-group (k,k,sub) depthwise kernels into one (K*K, hidden) tap table
    (zeros outside each group's own kernel support)."""
    sub = hidden // len(kernel_sizes)
    K = max(kernel_sizes)
    w = np.zeros((K * K, hidden), np.float32)
    for g, k in enumerate(kernel_sizes):
        off = (K - 1) // 2 - (k - 1) // 2
        dwg = np.asarray(dw_list[g], np.float32)                  # (k, k, sub)
        for dy in range(k):
            for dx in range(k):
                w[(off + dy) * K + (off + dx), g * sub:(g + 1) * sub] = dwg[dy, dx]
    return w


def _dw_shift_matrices(dw_list, kernel_sizes, hidden, W, dilate, bn2_scale):
    """K banded (W*hidden, W*hidden) matrices turning the dilated mixed depthwise conv
    into matmuls in the (H, W*hidden) lane-dense layout.  W zero-padding, per-group
    kernel support and the BN2 scale are all encoded in the band structure."""
    K = max(kernel_sizes)
    pad = (K - 1) // 2 * dilate
    taps = _combined_dw(dw_list, kernel_sizes, hidden) * bn2_scale[None, :]
    Whid = W * hidden
    T = np.zeros((K, Whid, Whid), np.float32)
    for dy in range(K):
        for dx in range(K):
            tap = taps[dy * K + dx]                               # (hidden,)
            diag = np.diag(tap)
            for w_out in range(W):
                w_src = w_out + dx * dilate - pad
                if 0 <= w_src < W:
                    T[dy,
                      w_src * hidden:(w_src + 1) * hidden,
                      w_out * hidden:(w_out + 1) * hidden] = diag
    return T


# ----------------------------------------------------------------------------
# Pallas forward
# ----------------------------------------------------------------------------
def mixdepth_block_forward(x_nchw, params, cfg):
    Cin, Cout = cfg["in_planes"], cfg["out_planes"]
    er = cfg["expand_ratio"]
    hidden = Cin * er
    ks = tuple(cfg["kernel_sizes"])
    K = max(ks)
    stride, dilate = cfg["stride"], cfg["dilate"]
    assert stride == 1  # TODO(synk): stride=2 downsampling path not implemented
    dilate = 1 if stride > 1 else dilate
    rr = cfg["reduction_ratio"]
    use_se = rr is not None and rr > 1
    use_residual = (Cin == Cout) and (stride == 1)
    use_expand = er != 1

    x = jnp.transpose(x_nchw, (0, 2, 3, 1)).astype(jnp.float32)    # NCHW -> NHWC
    N, H, W, _ = x.shape
    Whid, Wcin, Wcout = W * hidden, W * Cin, W * Cout
    x_flat = x.reshape(N * H, Wcin)                                 # lane-dense (W folded)

    pad = (K - 1) // 2 * dilate
    Hp = H + 2 * pad

    # Generation-aware grid: one batch tile per TensorCore.  v7x -> grid=(2,) "parallel";
    # v5e/v6e -> whole batch in one block so every matmul sees M = N*H rows.
    num_blocks = max(1, min(_num_tensorcores(), N))
    if N % num_blocks != 0:
        num_blocks = 1
    Nb = N // num_blocks

    wdt = jnp.bfloat16   # MXU weight / LHS dtype (f32 accumulation kept everywhere)

    args = [x_flat]
    in_specs = [pl.BlockSpec((Nb * H, Wcin), lambda n: (n, 0))]

    # --- expansion weights: kron(I_W, block_diag) with BN1 scale folded in ---
    if use_expand:
        s1, b1 = _fold_bn(params["bn1"])
        wexp = _block_diag(params["exp_w"]) * s1[None, :]          # (Cin, hidden)
        wexp_big = np.kron(np.eye(W, dtype=np.float32), wexp)      # (W*Cin, W*hidden)
        bexp_big = np.tile(b1, W)[None, :]                         # (1, W*hidden)
        args += [jnp.asarray(wexp_big, dtype=wdt), jnp.asarray(bexp_big)]
        in_specs += [pl.BlockSpec((Wcin, Whid), lambda n: (0, 0)),
                     pl.BlockSpec((1, Whid), lambda n: (0, 0))]

    # --- depthwise band matrices (BN2 scale folded), pre-flattened for one contraction ---
    s2, b2 = _fold_bn(params["bn2"])
    tdw = _dw_shift_matrices(params["dw_w"], ks, hidden, W, dilate, s2)
    tdw_flat = tdw.reshape(K * Whid, Whid)                         # (K*Whid, Whid)
    bdw_big = np.tile(b2, W)[None, :]                              # (1, W*hidden)
    args += [jnp.asarray(tdw_flat, dtype=wdt), jnp.asarray(bdw_big)]
    in_specs += [pl.BlockSpec((K * Whid, Whid), lambda n: (0, 0)),
                 pl.BlockSpec((1, Whid), lambda n: (0, 0))]

    # --- squeeze-excite weights (avg-pool /W folded into fc1, gate tiled over W in fc2) ---
    if use_se:
        w1 = np.asarray(params["se_w1"], np.float32)               # (hidden, reduced)
        reduced = w1.shape[1]
        sew1_t = np.tile(w1.T / float(W), (1, W))                  # (reduced, W*hidden)
        seb1 = np.asarray(params["se_b1"], np.float32)             # (reduced,) -> SMEM
        sew2_t = np.tile(np.asarray(params["se_w2"], np.float32), (1, W))  # (reduced, W*hidden)
        seb2_big = np.tile(np.asarray(params["se_b2"], np.float32), W)[None, :]
        args += [jnp.asarray(sew1_t), jnp.asarray(seb1),
                 jnp.asarray(sew2_t), jnp.asarray(seb2_big)]
        in_specs += [pl.BlockSpec((reduced, Whid), lambda n: (0, 0)),
                     pl.BlockSpec(memory_space=pltpu.MemorySpace.SMEM),
                     pl.BlockSpec((reduced, Whid), lambda n: (0, 0)),
                     pl.BlockSpec((1, Whid), lambda n: (0, 0))]
    else:
        reduced = 0

    # --- pointwise weights: kron(I_W, block_diag) with BN3 scale folded in ---
    s3, b3 = _fold_bn(params["bn3"])
    wpw = _block_diag(params["pw_w"]) * s3[None, :]                # (hidden, Cout)
    wpw_big = np.kron(np.eye(W, dtype=np.float32), wpw)            # (W*hidden, W*Cout)
    bpw_big = np.tile(b3, W)[None, :]                              # (1, W*Cout)
    args += [jnp.asarray(wpw_big, dtype=wdt), jnp.asarray(bpw_big)]
    in_specs += [pl.BlockSpec((Whid, Wcout), lambda n: (0, 0)),
                 pl.BlockSpec((1, Wcout), lambda n: (0, 0))]

    kernel = _make_fused_kernel(Nb, H, Hp, Whid, K, dilate, pad,
                                use_expand, use_se, use_residual, reduced)

    out_flat = pl.pallas_call(
        kernel,
        out_shape=jax.ShapeDtypeStruct((N * H, Wcout), jnp.float32),
        grid=(num_blocks,),
        in_specs=in_specs,
        out_specs=pl.BlockSpec((Nb * H, Wcout), lambda n: (n, 0)),
        scratch_shapes=[pltpu.VMEM((Nb * Hp, Whid), jnp.float32)],
        compiler_params=pltpu.CompilerParams(
            dimension_semantics=("parallel",)),                    # v7x: split over 2 TCs
    )(*args)

    out = out_flat.reshape(N, H, W, Cout)
    return jnp.transpose(out, (0, 3, 1, 2))                        # NHWC -> NCHW


# ----------------------------------------------------------------------------
# Parameter init (matches the PyTorch module's parameter structure)
# ----------------------------------------------------------------------------
def _init_bn(key, c):
    k1, k2, k3, k4 = jax.random.split(key, 4)
    return dict(
        gamma=jax.random.uniform(k1, (c,), jnp.float32, 0.5, 1.5),
        beta=jax.random.normal(k2, (c,), jnp.float32) * 0.1,
        mean=jax.random.normal(k3, (c,), jnp.float32) * 0.1,
        var=jax.random.uniform(k4, (c,), jnp.float32, 0.5, 1.5),
    )


def init_params(key, cfg):
    Cin, Cout = cfg["in_planes"], cfg["out_planes"]
    hidden = Cin * cfg["expand_ratio"]
    ks = cfg["kernel_sizes"]
    sub = hidden // len(ks)
    ge, gp = cfg["num_exp_groups"], cfg["num_poi_groups"]
    reduced = max(1, int(Cin / cfg["reduction_ratio"]))

    keys = iter(jax.random.split(key, 32))

    def nrm(shape, scale=0.3):
        return jax.random.normal(next(keys), shape, jnp.float32) * scale

    p = {}
    p["exp_w"] = [nrm((Cin // ge, hidden // ge)) for _ in range(ge)]      # GPConv (expansion)
    p["bn1"] = _init_bn(next(keys), hidden)
    p["dw_w"] = [nrm((k, k, sub)) for k in ks]                            # MDConv depthwise
    p["bn2"] = _init_bn(next(keys), hidden)
    p["se_w1"] = nrm((hidden, reduced))                                   # SE fc1
    p["se_b1"] = nrm((reduced,), 0.1)
    p["se_w2"] = nrm((reduced, hidden))                                   # SE fc2
    p["se_b2"] = nrm((hidden,), 0.1)
    p["pw_w"] = [nrm((hidden // gp, Cout // gp)) for _ in range(gp)]      # GPConv (pointwise)
    p["bn3"] = _init_bn(next(keys), Cout)
    return p


# ----------------------------------------------------------------------------
# Pure-JAX reference (lax convolutions) for the correctness check
# ----------------------------------------------------------------------------
def mixdepth_block_reference(x_nchw, params, cfg):
    eps = 1e-3
    Cin, Cout = cfg["in_planes"], cfg["out_planes"]
    er = cfg["expand_ratio"]
    hidden = Cin * er
    ks = cfg["kernel_sizes"]
    sub = hidden // len(ks)
    ge, gp = cfg["num_exp_groups"], cfg["num_poi_groups"]
    stride, dilate = cfg["stride"], cfg["dilate"]
    dilate = 1 if stride > 1 else dilate
    rr = cfg["reduction_ratio"]
    use_se = rr is not None and rr > 1
    use_residual = (Cin == Cout) and (stride == 1)
    hi = jax.lax.Precision.HIGHEST
    dn = ("NHWC", "HWIO", "NHWC")

    def bn(v, b):
        return (v - b["mean"]) / jnp.sqrt(b["var"] + eps) * b["gamma"] + b["beta"]

    x = jnp.transpose(x_nchw, (0, 2, 3, 1)).astype(jnp.float32)
    h = x
    if er != 1:
        w = jnp.concatenate(params["exp_w"], axis=1)[None, None]
        h = lax.conv_general_dilated(h, w, (1, 1), "VALID", dimension_numbers=dn,
                                     feature_group_count=ge, precision=hi)
        h = bn(h, params["bn1"])
        h = h * jax.nn.sigmoid(h)
    outs = []
    for g, k in enumerate(ks):
        p = (k - 1) // 2 * dilate
        hg = h[..., g * sub:(g + 1) * sub]
        wg = params["dw_w"][g][:, :, None, :]
        og = lax.conv_general_dilated(hg, wg, (stride, stride), [(p, p), (p, p)],
                                      rhs_dilation=(dilate, dilate),
                                      dimension_numbers=dn,
                                      feature_group_count=sub, precision=hi)
        outs.append(og)
    d = jnp.concatenate(outs, axis=-1)
    d = bn(d, params["bn2"])
    d = d * jax.nn.sigmoid(d)
    if use_se:
        pooled = jnp.mean(d, axis=(1, 2))
        s = pooled @ params["se_w1"] + params["se_b1"]
        s = s * jax.nn.sigmoid(s)
        s = s @ params["se_w2"] + params["se_b2"]
        s = jax.nn.sigmoid(s)
        d = d * s[:, None, None, :]
    w = jnp.concatenate(params["pw_w"], axis=1)[None, None]
    o = lax.conv_general_dilated(d, w, (1, 1), "VALID", dimension_numbers=dn,
                                 feature_group_count=gp, precision=hi)
    o = bn(o, params["bn3"])
    if use_residual:
        o = o + x
    return jnp.transpose(o, (0, 3, 1, 2))


if __name__ == "__main__":
    cfg = dict(in_planes=8, out_planes=8, expand_ratio=2, num_exp_groups=2,
               kernel_sizes=(3, 5), num_poi_groups=2, stride=1, dilate=1,
               reduction_ratio=4, dropout_rate=0.2)   # eval mode: dropout2d is a no-op

    key = jax.random.PRNGKey(0)
    pkey, xkey = jax.random.split(key)
    params = init_params(pkey, cfg)
    x = jax.random.normal(xkey, (2, cfg["in_planes"], 16, 16), jnp.float32)  # NCHW input

    out = jax.block_until_ready(mixdepth_block_forward(x, params, cfg))
    ref = jax.block_until_ready(mixdepth_block_reference(x, params, cfg))

    assert out.shape == ref.shape == (2, cfg["out_planes"], 16, 16)
    max_err = float(jnp.max(jnp.abs(out - ref)))
    assert max_err < 5e-2, f"max abs error {max_err}"
    print("KERNEL_OK")
</pallas_src>

<mosaic_0001>
module attributes {stable_mosaic.version = 11 : i64} {
  func.func @kernel(%arg0: i32, %arg1: memref<32x128xf32, #tpu.memory_space<vmem>>, %arg2: memref<128x256xbf16, #tpu.memory_space<vmem>>, %arg3: memref<1x256xf32, #tpu.memory_space<vmem>>, %arg4: memref<1280x256xbf16, #tpu.memory_space<vmem>>, %arg5: memref<1x256xf32, #tpu.memory_space<vmem>>, %arg6: memref<2x256xf32, #tpu.memory_space<vmem>>, %arg7: memref<2xf32, #tpu.memory_space<smem>>, %arg8: memref<2x256xf32, #tpu.memory_space<vmem>>, %arg9: memref<1x256xf32, #tpu.memory_space<vmem>>, %arg10: memref<256x128xbf16, #tpu.memory_space<vmem>>, %arg11: memref<1x128xf32, #tpu.memory_space<vmem>>, %arg12: memref<32x128xf32, #tpu.memory_space<vmem>>, %arg13: memref<40x256xf32, #tpu.memory_space<vmem>>) attributes {dimension_semantics = [#tpu.dimension_semantics<parallel>], iteration_bounds = array<i64: 1>, scalar_prefetch = 0 : i64, scratch_operands = 1 : i64, tpu.core_type = #tpu.core_type<tc>, window_params = [{transform_indices = @transform_0, window_bounds = array<i64: 32, 128>}, {pipeline_mode = #tpu.pipeline_mode<synchronous>, transform_indices = @transform_1, window_bounds = array<i64: 128, 256>}, {pipeline_mode = #tpu.pipeline_mode<synchronous>, transform_indices = @transform_2, window_bounds = array<i64: 1, 256>}, {pipeline_mode = #tpu.pipeline_mode<synchronous>, transform_indices = @transform_3, window_bounds = array<i64: 1280, 256>}, {pipeline_mode = #tpu.pipeline_mode<synchronous>, transform_indices = @transform_4, window_bounds = array<i64: 1, 256>}, {pipeline_mode = #tpu.pipeline_mode<synchronous>, transform_indices = @transform_5, window_bounds = array<i64: 2, 256>}, {transform_indices = @transform_6, window_bounds = array<i64: 2>}, {pipeline_mode = #tpu.pipeline_mode<synchronous>, transform_indices = @transform_7, window_bounds = array<i64: 2, 256>}, {pipeline_mode = #tpu.pipeline_mode<synchronous>, transform_indices = @transform_8, window_bounds = array<i64: 1, 256>}, {pipeline_mode = #tpu.pipeline_mode<synchronous>, transform_indices = @transform_9, window_bounds = array<i64: 256, 128>}, {pipeline_mode = #tpu.pipeline_mode<synchronous>, transform_indices = @transform_10, window_bounds = array<i64: 1, 128>}, {transform_indices = @transform_11, window_bounds = array<i64: 32, 128>}]} {
    %c0 = arith.constant 0 : index
    %c0_0 = arith.constant 0 : index
    %0 = vector.load %arg1[%c0, %c0_0] : memref<32x128xf32, #tpu.memory_space<vmem>>, vector<32x128xf32>
    %1 = arith.truncf %0 : vector<32x128xf32> to vector<32x128xbf16>
    %c0_1 = arith.constant 0 : index
    %c0_2 = arith.constant 0 : index
    %2 = vector.load %arg2[%c0_1, %c0_2] : memref<128x256xbf16, #tpu.memory_space<vmem>>, vector<128x256xbf16>
    %cst = arith.constant dense<0.000000e+00> : vector<32x256xf32>
    %3 = tpu.matmul %1, %2, %cst {dimension_numbers = #tpu.dot_dimension_numbers<[1], [0], [0], [1], [0, 0, 1, 1], [], []>} : vector<32x128xbf16>, vector<128x256xbf16>, vector<32x256xf32> -> vector<32x256xf32>
    %c0_3 = arith.constant 0 : index
    %c0_4 = arith.constant 0 : index
    %4 = vector.load %arg3[%c0_3, %c0_4] : memref<1x256xf32, #tpu.memory_space<vmem>>, vector<1x256xf32>
    %5 = vector.broadcast %4 : vector<1x256xf32> to vector<32x256xf32>
    %6 = arith.addf %3, %5 : vector<32x256xf32>
    %7 = arith.negf %6 : vector<32x256xf32>
    %8 = math.exp %7 : vector<32x256xf32>
    %cst_5 = arith.constant 1.000000e+00 : f32
    %9 = vector.broadcast %cst_5 : f32 to vector<32x256xf32>
    %10 = arith.addf %9, %8 : vector<32x256xf32>
    %11 = arith.divf %9, %10 : vector<32x256xf32>
    %12 = arith.mulf %6, %11 : vector<32x256xf32>
    %cst_6 = arith.constant 0.000000e+00 : f32
    %13 = vector.broadcast %cst_6 : f32 to vector<2x256xf32>
    %14 = vector.extract_strided_slice %12 {offsets = [0, 0], sizes = [16, 256], strides = [1, 1]} : vector<32x256xf32> to vector<16x256xf32>
    %c0_7 = arith.constant 0 : index
    %c0_8 = arith.constant 0 : index
    %15 = vector.load %arg13[%c0_7, %c0_8] : memref<40x256xf32, #tpu.memory_space<vmem>>, vector<2x256xf32>
    tpu.vector_store %arg13[%c0_7, %c0_8], %13 {strides = array<i32>} : memref<40x256xf32, #tpu.memory_space<vmem>>, vector<2x256xf32>,
    %c18 = arith.constant 18 : index
    %c0_9 = arith.constant 0 : index
    %16 = vector.load %arg13[%c18, %c0_9] : memref<40x256xf32, #tpu.memory_space<vmem>>, vector<2x256xf32>
    tpu.vector_store %arg13[%c18, %c0_9], %13 {strides = array<i32>} : memref<40x256xf32, #tpu.memory_space<vmem>>, vector<2x256xf32>,
    %c2 = arith.constant 2 : index
    %c0_10 = arith.constant 0 : index
    %17 = vector.load %arg13[%c2, %c0_10] : memref<40x256xf32, #tpu.memory_space<vmem>>, vector<16x256xf32>
    tpu.vector_store %arg13[%c2, %c0_10], %14 {strides = array<i32>} : memref<40x256xf32, #tpu.memory_space<vmem>>, vector<16x256xf32>,
    %c0_11 = arith.constant 0 : index
    %c0_12 = arith.constant 0 : index
    %18 = vector.load %arg13[%c0_11, %c0_12] : memref<40x256xf32, #tpu.memory_space<vmem>>, vector<16x256xf32>
    %c1 = arith.constant 1 : index
    %c0_13 = arith.constant 0 : index
    %19 = vector.load %arg13[%c1, %c0_13] : memref<40x256xf32, #tpu.memory_space<vmem>>, vector<16x256xf32>
    %c3 = arith.constant 3 : index
    %c0_14 = arith.constant 0 : index
    %20 = vector.load %arg13[%c3, %c0_14] : memref<40x256xf32, #tpu.memory_space<vmem>>, vector<16x256xf32>
    %c4 = arith.constant 4 : index
    %c0_15 = arith.constant 0 : index
    %21 = vector.load %arg13[%c4, %c0_15] : memref<40x256xf32, #tpu.memory_space<vmem>>, vector<16x256xf32>
    %22 = tpu.concatenate %18, %19, %14, %20, %21 in 1 : vector<16x256xf32>, vector<16x256xf32>, vector<16x256xf32>, vector<16x256xf32>, vector<16x256xf32> -> vector<16x1280xf32>
    %23 = vector.extract_strided_slice %12 {offsets = [16, 0], sizes = [16, 256], strides = [1, 1]} : vector<32x256xf32> to vector<16x256xf32>
    %c20 = arith.constant 20 : index
    %c0_16 = arith.constant 0 : index
    %24 = vector.load %arg13[%c20, %c0_16] : memref<40x256xf32, #tpu.memory_space<vmem>>, vector<2x256xf32>
    tpu.vector_store %arg13[%c20, %c0_16], %13 {strides = array<i32>} : memref<40x256xf32, #tpu.memory_space<vmem>>, vector<2x256xf32>,
    %c38 = arith.constant 38 : index
    %c0_17 = arith.constant 0 : index
    %25 = vector.load %arg13[%c38, %c0_17] : memref<40x256xf32, #tpu.memory_space<vmem>>, vector<2x256xf32>
    tpu.vector_store %arg13[%c38, %c0_17], %13 {strides = array<i32>} : memref<40x256xf32, #tpu.memory_space<vmem>>, vector<2x256xf32>,
    %c22 = arith.constant 22 : index
    %c0_18 = arith.constant 0 : index
    %26 = vector.load %arg13[%c22, %c0_18] : memref<40x256xf32, #tpu.memory_space<vmem>>, vector<16x256xf32>
    tpu.vector_store %arg13[%c22, %c0_18], %23 {strides = array<i32>} : memref<40x256xf32, #tpu.memory_space<vmem>>, vector<16x256xf32>,
    %c20_19 = arith.constant 20 : index
    %c0_20 = arith.constant 0 : index
    %27 = vector.load %arg13[%c20_19, %c0_20] : memref<40x256xf32, #tpu.memory_space<vmem>>, vector<16x256xf32>
    %c21 = arith.constant 21 : index
    %c0_21 = arith.constant 0 : index
    %28 = vector.load %arg13[%c21, %c0_21] : memref<40x256xf32, #tpu.memory_space<vmem>>, vector<16x256xf32>
    %c23 = arith.constant 23 : index
    %c0_22 = arith.constant 0 : index
    %29 = vector.load %arg13[%c23, %c0_22] : memref<40x256xf32, #tpu.memory_space<vmem>>, vector<16x256xf32>
    %c24 = arith.constant 24 : index
    %c0_23 = arith.constant 0 : index
    %30 = vector.load %arg13[%c24, %c0_23] : memref<40x256xf32, #tpu.memory_space<vmem>>, vector<16x256xf32>
    %31 = tpu.concatenate %27, %28, %23, %29, %30 in 1 : vector<16x256xf32>, vector<16x256xf32>, vector<16x256xf32>, vector<16x256xf32>, vector<16x256xf32> -> vector<16x1280xf32>
    %32 = tpu.concatenate %22, %31 in 0 : vector<16x1280xf32>, vector<16x1280xf32> -> vector<32x1280xf32>
    %33 = arith.truncf %32 : vector<32x1280xf32> to vector<32x1280xbf16>
    %c0_24 = arith.constant 0 : index
    %c0_25 = arith.constant 0 : index
    %34 = vector.load %arg4[%c0_24, %c0_25] : memref<1280x256xbf16, #tpu.memory_space<vmem>>, vector<1280x256xbf16>
    %cst_26 = arith.constant dense<0.000000e+00> : vector<32x256xf32>
    %35 = tpu.matmul %33, %34, %cst_26 {dimension_numbers = #tpu.dot_dimension_numbers<[1], [0], [0], [1], [0, 0, 1, 1], [], []>} : vector<32x1280xbf16>, vector<1280x256xbf16>, vector<32x256xf32> -> vector<32x256xf32>
    %c0_27 = arith.constant 0 : index
    %c0_28 = arith.constant 0 : index
    %36 = vector.load %arg5[%c0_27, %c0_28] : memref<1x256xf32, #tpu.memory_space<vmem>>, vector<1x256xf32>
    %37 = vector.broadcast %36 : vector<1x256xf32> to vector<32x256xf32>
    %38 = arith.addf %35, %37 : vector<32x256xf32>
    %39 = arith.negf %38 : vector<32x256xf32>
    %40 = math.exp %39 : vector<32x256xf32>
    %cst_29 = arith.constant 1.000000e+00 : f32
    %41 = vector.broadcast %cst_29 : f32 to vector<32x256xf32>
    %42 = arith.addf %41, %40 : vector<32x256xf32>
    %43 = arith.divf %41, %42 : vector<32x256xf32>
    %44 = arith.mulf %38, %43 : vector<32x256xf32>
    %c0_30 = arith.constant 0 : index
    %c0_31 = arith.constant 0 : index
    %45 = vector.load %arg6[%c0_30, %c0_31] : memref<2x256xf32, #tpu.memory_space<vmem>>, vector<2x256xf32>
    %c0_32 = arith.constant 0 : index
    %c0_33 = arith.constant 0 : index
    %46 = vector.load %arg8[%c0_32, %c0_33] : memref<2x256xf32, #tpu.memory_space<vmem>>, vector<2x256xf32>
    %c0_34 = arith.constant 0 : index
    %c0_35 = arith.constant 0 : index
    %47 = vector.load %arg9[%c0_34, %c0_35] : memref<1x256xf32, #tpu.memory_space<vmem>>, vector<1x256xf32>
    %48 = vector.extract_strided_slice %44 {offsets = [0, 0], sizes = [16, 256], strides = [1, 1]} : vector<32x256xf32> to vector<16x256xf32>
    %cst_36 = arith.constant dense<0.000000e+00> : vector<256xf32>
    %49 = vector.multi_reduction <add>, %48, %cst_36 [0] : vector<16x256xf32> to vector<256xf32>
    %50 = vector.shape_cast %49 : vector<256xf32> to vector<1x256xf32>
    %cst_37 = arith.constant 1.600000e+01 : f32
    %51 = vector.broadcast %cst_37 : f32 to vector<1x256xf32>
    %52 = arith.divf %50, %51 : vector<1x256xf32>
    %53 = vector.extract_strided_slice %45 {offsets = [0, 0], sizes = [1, 256], strides = [1, 1]} : vector<2x256xf32> to vector<1x256xf32>
    %54 = arith.mulf %52, %53 : vector<1x256xf32>
    %cst_38 = arith.constant dense<0.000000e+00> : vector<1xf32>
    %55 = vector.multi_reduction <add>, %54, %cst_38 [1] : vector<1x256xf32> to vector<1xf32>
    %56 = vector.shape_cast %55 : vector<1xf32> to vector<1x1xf32>
    %c0_39 = arith.constant 0 : index
    %57 = memref.load %arg7[%c0_39] : memref<2xf32, #tpu.memory_space<smem>>
    %58 = vector.broadcast %57 : f32 to vector<1x1xf32>
    %59 = arith.addf %56, %58 : vector<1x1xf32>
    %60 = arith.negf %59 : vector<1x1xf32>
    %61 = math.exp %60 : vector<1x1xf32>
    %cst_40 = arith.constant 1.000000e+00 : f32
    %62 = vector.broadcast %cst_40 : f32 to vector<1x1xf32>
    %63 = arith.addf %62, %61 : vector<1x1xf32>
    %64 = arith.divf %62, %63 : vector<1x1xf32>
    %65 = arith.mulf %59, %64 : vector<1x1xf32>
    %66 = vector.extract_strided_slice %46 {offsets = [0, 0], sizes = [1, 256], strides = [1, 1]} : vector<2x256xf32> to vector<1x256xf32>
    %67 = vector.broadcast %65 : vector<1x1xf32> to vector<1x256xf32>
    %68 = arith.mulf %67, %66 : vector<1x256xf32>
    %69 = arith.addf %47, %68 : vector<1x256xf32>
    %70 = vector.extract_strided_slice %45 {offsets = [1, 0], sizes = [1, 256], strides = [1, 1]} : vector<2x256xf32> to vector<1x256xf32>
    %71 = arith.mulf %52, %70 : vector<1x256xf32>
    %cst_41 = arith.constant dense<0.000000e+00> : vector<1xf32>
    %72 = vector.multi_reduction <add>, %71, %cst_41 [1] : vector<1x256xf32> to vector<1xf32>
    %73 = vector.shape_cast %72 : vector<1xf32> to vector<1x1xf32>
    %c1_42 = arith.constant 1 : index
    %74 = memref.load %arg7[%c1_42] : memref<2xf32, #tpu.memory_space<smem>>
    %75 = vector.broadcast %74 : f32 to vector<1x1xf32>
    %76 = arith.addf %73, %75 : vector<1x1xf32>
    %77 = arith.negf %76 : vector<1x1xf32>
    %78 = math.exp %77 : vector<1x1xf32>
    %cst_43 = arith.constant 1.000000e+00 : f32
    %79 = vector.broadcast %cst_43 : f32 to vector<1x1xf32>
    %80 = arith.addf %79, %78 : vector<1x1xf32>
    %81 = arith.divf %79, %80 : vector<1x1xf32>
    %82 = arith.mulf %76, %81 : vector<1x1xf32>
    %83 = vector.extract_strided_slice %46 {offsets = [1, 0], sizes = [1, 256], strides = [1, 1]} : vector<2x256xf32> to vector<1x256xf32>
    %84 = vector.broadcast %82 : vector<1x1xf32> to vector<1x256xf32>
    %85 = arith.mulf %84, %83 : vector<1x256xf32>
    %86 = arith.addf %69, %85 : vector<1x256xf32>
    %87 = arith.negf %86 : vector<1x256xf32>
    %88 = math.exp %87 : vector<1x256xf32>
    %cst_44 = arith.constant 1.000000e+00 : f32
    %89 = vector.broadcast %cst_44 : f32 to vector<1x256xf32>
    %90 = arith.addf %89, %88 : vector<1x256xf32>
    %91 = arith.divf %89, %90 : vector<1x256xf32>
    %92 = vector.broadcast %91 : vector<1x256xf32> to vector<16x256xf32>
    %93 = arith.mulf %48, %92 : vector<16x256xf32>
    %94 = vector.extract_strided_slice %44 {offsets = [16, 0], sizes = [16, 256], strides = [1, 1]} : vector<32x256xf32> to vector<16x256xf32>
    %cst_45 = arith.constant dense<0.000000e+00> : vector<256xf32>
    %95 = vector.multi_reduction <add>, %94, %cst_45 [0] : vector<16x256xf32> to vector<256xf32>
    %96 = vector.shape_cast %95 : vector<256xf32> to vector<1x256xf32>
    %cst_46 = arith.constant 1.600000e+01 : f32
    %97 = vector.broadcast %cst_46 : f32 to vector<1x256xf32>
    %98 = arith.divf %96, %97 : vector<1x256xf32>
    %99 = vector.extract_strided_slice %45 {offsets = [0, 0], sizes = [1, 256], strides = [1, 1]} : vector<2x256xf32> to vector<1x256xf32>
    %100 = arith.mulf %98, %99 : vector<1x256xf32>
    %cst_47 = arith.constant dense<0.000000e+00> : vector<1xf32>
    %101 = vector.multi_reduction <add>, %100, %cst_47 [1] : vector<1x256xf32> to vector<1xf32>
    %102 = vector.shape_cast %101 : vector<1xf32> to vector<1x1xf32>
    %c0_48 = arith.constant 0 : index
    %103 = memref.load %arg7[%c0_48] : memref<2xf32, #tpu.memory_space<smem>>
    %104 = vector.broadcast %103 : f32 to vector<1x1xf32>
    %105 = arith.addf %102, %104 : vector<1x1xf32>
    %106 = arith.negf %105 : vector<1x1xf32>
    %107 = math.exp %106 : vector<1x1xf32>
    %cst_49 = arith.constant 1.000000e+00 : f32
    %108 = vector.broadcast %cst_49 : f32 to vector<1x1xf32>
    %109 = arith.addf %108, %107 : vector<1x1xf32>
    %110 = arith.divf %108, %109 : vector<1x1xf32>
    %111 = arith.mulf %105, %110 : vector<1x1xf32>
    %112 = vector.extract_strided_slice %46 {offsets = [0, 0], sizes = [1, 256], strides = [1, 1]} : vector<2x256xf32> to vector<1x256xf32>
    %113 = vector.broadcast %111 : vector<1x1xf32> to vector<1x256xf32>
    %114 = arith.mulf %113, %112 : vector<1x256xf32>
    %115 = arith.addf %47, %114 : vector<1x256xf32>
    %116 = vector.extract_strided_slice %45 {offsets = [1, 0], sizes = [1, 256], strides = [1, 1]} : vector<2x256xf32> to vector<1x256xf32>
    %117 = arith.mulf %98, %116 : vector<1x256xf32>
    %cst_50 = arith.constant dense<0.000000e+00> : vector<1xf32>
    %118 = vector.multi_reduction <add>, %117, %cst_50 [1] : vector<1x256xf32> to vector<1xf32>
    %119 = vector.shape_cast %118 : vector<1xf32> to vector<1x1xf32>
    %c1_51 = arith.constant 1 : index
    %120 = memref.load %arg7[%c1_51] : memref<2xf32, #tpu.memory_space<smem>>
    %121 = vector.broadcast %120 : f32 to vector<1x1xf32>
    %122 = arith.addf %119, %121 : vector<1x1xf32>
    %123 = arith.negf %122 : vector<1x1xf32>
    %124 = math.exp %123 : vector<1x1xf32>
    %cst_52 = arith.constant 1.000000e+00 : f32
    %125 = vector.broadcast %cst_52 : f32 to vector<1x1xf32>
    %126 = arith.addf %125, %124 : vector<1x1xf32>
    %127 = arith.divf %125, %126 : vector<1x1xf32>
    %128 = arith.mulf %122, %127 : vector<1x1xf32>
    %129 = vector.extract_strided_slice %46 {offsets = [1, 0], sizes = [1, 256], strides = [1, 1]} : vector<2x256xf32> to vector<1x256xf32>
    %130 = vector.broadcast %128 : vector<1x1xf32> to vector<1x256xf32>
    %131 = arith.mulf %130, %129 : vector<1x256xf32>
    %132 = arith.addf %115, %131 : vector<1x256xf32>
    %133 = arith.negf %132 : vector<1x256xf32>
    %134 = math.exp %133 : vector<1x256xf32>
    %cst_53 = arith.constant 1.000000e+00 : f32
    %135 = vector.broadcast %cst_53 : f32 to vector<1x256xf32>
    %136 = arith.addf %135, %134 : vector<1x256xf32>
    %137 = arith.divf %135, %136 : vector<1x256xf32>
    %138 = vector.broadcast %137 : vector<1x256xf32> to vector<16x256xf32>
    %139 = arith.mulf %94, %138 : vector<16x256xf32>
    %140 = tpu.concatenate %93, %139 in 0 : vector<16x256xf32>, vector<16x256xf32> -> vector<32x256xf32>
    %141 = arith.truncf %140 : vector<32x256xf32> to vector<32x256xbf16>
    %c0_54 = arith.constant 0 : index
    %c0_55 = arith.constant 0 : index
    %142 = vector.load %arg10[%c0_54, %c0_55] : memref<256x128xbf16, #tpu.memory_space<vmem>>, vector<256x128xbf16>
    %cst_56 = arith.constant dense<0.000000e+00> : vector<32x128xf32>
    %143 = tpu.matmul %141, %142, %cst_56 {dimension_numbers = #tpu.dot_dimension_numbers<[1], [0], [0], [1], [0, 0, 1, 1], [], []>} : vector<32x256xbf16>, vector<256x128xbf16>, vector<32x128xf32> -> vector<32x128xf32>
    %c0_57 = arith.constant 0 : index
    %c0_58 = arith.constant 0 : index
    %144 = vector.load %arg11[%c0_57, %c0_58] : memref<1x128xf32, #tpu.memory_space<vmem>>, vector<1x128xf32>
    %145 = vector.broadcast %144 : vector<1x128xf32> to vector<32x128xf32>
    %146 = arith.addf %143, %145 : vector<32x128xf32>
    %147 = arith.addf %146, %0 : vector<32x128xf32>
    %c0_59 = arith.constant 0 : index
    %c0_60 = arith.constant 0 : index
    %148 = vector.load %arg12[%c0_59, %c0_60] : memref<32x128xf32, #tpu.memory_space<vmem>>, vector<32x128xf32>
    tpu.vector_store %arg12[%c0_59, %c0_60], %147 {strides = array<i32>} : memref<32x128xf32, #tpu.memory_space<vmem>>, vector<32x128xf32>,
    return
  }
  func.func @transform_0(%arg0: i32) -> (i32, i32) {
    %c0_i32 = arith.constant 0 : i32
    %c0_i32_0 = arith.constant 0 : i32
    return %arg0, %c0_i32 : i32, i32
  }
  func.func @transform_1(%arg0: i32) -> (i32, i32) {
    %c0_i32 = arith.constant 0 : i32
    %c0_i32_0 = arith.constant 0 : i32
    %c0_i32_1 = arith.constant 0 : i32
    return %c0_i32, %c0_i32_0 : i32, i32
  }
  func.func @transform_2(%arg0: i32) -> (i32, i32) {
    %c0_i32 = arith.constant 0 : i32
    %c0_i32_0 = arith.constant 0 : i32
    %c0_i32_1 = arith.constant 0 : i32
    return %c0_i32, %c0_i32_0 : i32, i32
  }
  func.func @transform_3(%arg0: i32) -> (i32, i32) {
    %c0_i32 = arith.constant 0 : i32
    %c0_i32_0 = arith.constant 0 : i32
    %c0_i32_1 = arith.constant 0 : i32
    return %c0_i32, %c0_i32_0 : i32, i32
  }
  func.func @transform_4(%arg0: i32) -> (i32, i32) {
    %c0_i32 = arith.constant 0 : i32
    %c0_i32_0 = arith.constant 0 : i32
    %c0_i32_1 = arith.constant 0 : i32
    return %c0_i32, %c0_i32_0 : i32, i32
  }
  func.func @transform_5(%arg0: i32) -> (i32, i32) {
    %c0_i32 = arith.constant 0 : i32
    %c0_i32_0 = arith.constant 0 : i32
    %c0_i32_1 = arith.constant 0 : i32
    return %c0_i32, %c0_i32_0 : i32, i32
  }
  func.func @transform_6(%arg0: i32) -> i32 {
    %c0_i32 = arith.constant 0 : i32
    %c0_i32_0 = arith.constant 0 : i32
    return %c0_i32 : i32
  }
  func.func @transform_7(%arg0: i32) -> (i32, i32) {
    %c0_i32 = arith.constant 0 : i32
    %c0_i32_0 = arith.constant 0 : i32
    %c0_i32_1 = arith.constant 0 : i32
    return %c0_i32, %c0_i32_0 : i32, i32
  }
  func.func @transform_8(%arg0: i32) -> (i32, i32) {
    %c0_i32 = arith.constant 0 : i32
    %c0_i32_0 = arith.constant 0 : i32
    %c0_i32_1 = arith.constant 0 : i32
    return %c0_i32, %c0_i32_0 : i32, i32
  }
  func.func @transform_9(%arg0: i32) -> (i32, i32) {
    %c0_i32 = arith.constant 0 : i32
    %c0_i32_0 = arith.constant 0 : i32
    %c0_i32_1 = arith.constant 0 : i32
    return %c0_i32, %c0_i32_0 : i32, i32
  }
  func.func @transform_10(%arg0: i32) -> (i32, i32) {
    %c0_i32 = arith.constant 0 : i32
    %c0_i32_0 = arith.constant 0 : i32
    %c0_i32_1 = arith.constant 0 : i32
    return %c0_i32, %c0_i32_0 : i32, i32
  }
  func.func @transform_11(%arg0: i32) -> (i32, i32) {
    %c0_i32 = arith.constant 0 : i32
    %c0_i32_0 = arith.constant 0 : i32
    return %arg0, %c0_i32 : i32, i32
  }
}

</mosaic_0001>

<bundles_post_ra>
// kernel: tpu_custom_call.1
= control target key start
LH: loop header
LB: loop body
LE: loop exit
PB: predicated region body
PF: predicated region fallthrough
CT: control target
= control target key end

     0   :  { %16 = vsyncpa [#allocation4], 0  ;;  %s3587_s0 = inlined_call_operand.hbm [shape: f32[32,128], index: 0, kind: input, shape index: {}]   ;;  %s3588_s1 = inlined_call_operand.hbm [shape: bf16[128,256], index: 1, kind: input, shape index: {}]   ;;  %s3589_s2 = inlined_call_operand.hbm [shape: f32[1,256], index: 2, kind: input, shape index: {}]   ;;  %s3590_s3 = inlined_call_operand.hbm [shape: bf16[1280,256], index: 3, kind: input, shape index: {}]   ;;  %s3591_s4 = inlined_call_operand.hbm [shape: f32[1,256], index: 4, kind: input, shape index: {}]   ;;  %s3592_s5 = inlined_call_operand.vmem [shape: f32[2,256], index: 5, kind: input, shape index: {}]   ;;  %s3593_s6 = inlined_call_operand.hbm [shape: f32[2], index: 6, kind: input, shape index: {}]   ;;  %s3594_s7 = inlined_call_operand.vmem [shape: f32[2,256], index: 7, kind: input, shape index: {}]   ;;  %s3595_s8 = inlined_call_operand.vmem [shape: f32[1,256], index: 8, kind: input, shape index: {}]   ;;  %s3596_s9 = inlined_call_operand.hbm [shape: bf16[256,128], index: 9, kind: input, shape index: {}]   ;;  %s3597_s10 = inlined_call_operand.vmem [shape: f32[1,128], index: 10, kind: input, shape index: {}]   ;;  %s3598_s11 = inlined_call_operand.hbm [shape: f32[32,128], index: 11, kind: output, shape index: {}]  }
   0x1   :  { %17 = vsyncpa [#allocation8], 0 }
   0x2   :  { %18 = vsyncpa [#allocation11], 0 }
   0x3   :  { %19 = vsyncpa [#allocation6], 0 }
   0x4   :  { %20 = vsyncpa [#allocation15], 0 }
   0x5   :  { %21 = vsyncpa [#allocation5], 0  ;;  %s3203_s17 = smov [#allocation7]   ;;  %s3204_s19 = smov [#allocation10]  }
   0x6   :  { %s39_s18 = sshll.u32 %s3203_s17, 4  ;;  %s61_s20 = sshll.u32 %s3204_s19, 4  ;;  %s40_s18 = int_to_ptr.vmem [resolvable:$true] %s39_s18  ;;  %s62_s20 = int_to_ptr.vmem [resolvable:$true] %s61_s20 }
   0x7   :  { %s3051_s21 = scalar_lea.vmem %s40_s18, 2048  ;;  %p3056_p1 = scmp.lt.s32.totalorder %s40_s18, %s40_s18 }
   0x8   :  { %p3052_p0 = scmp.ne.s32.totalorder %s40_s18, %s3051_s21  ;;  %p3057_p2 = scmp.lt.s32.totalorder %s3051_s21, %s3051_s21 }
   0xa   :  { %p3058_p3 = por %p3057_p2, %p3056_p1 }
   0xc   :  { %p3059_p4 = pnand %p3058_p3, %p3052_p0 }
   0xe   :  { %3062 = shalt.err (!%p3059_p4)
}
   0xf   :  { %s3205_s22 = smov 128   ;;  %s3206_s23 = smov 8  }
  0x10   :  { %45 = dma.hbm_to_vmem [thread:$0]  %s3588_s1, 2048, %s40_s18, [#allocation8], %s3205_s22, %s3205_s22, %s3206_s23  }
  0x11   :  { %s3071_s26 = scalar_lea.vmem %s62_s20, 20480  ;;  %p3076_p6 = scmp.lt.s32.totalorder %s62_s20, %s62_s20 }
  0x12   :  { %p3072_p5 = scmp.ne.s32.totalorder %s62_s20, %s3071_s26  ;;  %p3077_p7 = scmp.lt.s32.totalorder %s3071_s26, %s3071_s26 }
  0x14   :  { %p3078_p8 = por %p3077_p7, %p3076_p6 }
  0x16   :  { %p3079_p9 = pnand %p3078_p8, %p3072_p5 }
  0x18   :  { %3082 = shalt.err (!%p3079_p9)
}
  0x19   :  { %67 = dma.hbm_to_vmem [thread:$0]  %s3590_s3, 20480, %s62_s20, [#allocation11], %s3205_s22, %s3205_s22, %s3206_s23  }
  0x1a   :  { %s3207_s29 = smov [#allocation3]   ;;  %s3208_s12 = smov [#allocation9]  }
  0x1b   :  { %s27_s30 = sshll.u32 %s3207_s29, 4  ;;  %s52_s13 = sshll.u32 %s3208_s12, 4  ;;  %s28_s30 = int_to_ptr.vmem [resolvable:$true] %s27_s30  ;;  %s53_s13 = int_to_ptr.vmem [resolvable:$true] %s52_s13 }
  0x1c   :  { %s3091_s1 = scalar_lea.vmem %s28_s30, 512  ;;  %p3096_p11 = scmp.lt.s32.totalorder %s28_s30, %s28_s30 }
  0x1d   :  { %p3092_p10 = scmp.ne.s32.totalorder %s28_s30, %s3091_s1  ;;  %p3097_p12 = scmp.lt.s32.totalorder %s3091_s1, %s3091_s1 }
  0x1f   :  { %p3098_p13 = por %p3097_p12, %p3096_p11 }
  0x21   :  { %p3099_p0 = pnand %p3098_p13, %p3092_p10 }
  0x23   :  { %3102 = shalt.err (!%p3099_p0)
}
  0x24   :  { %33 = dma.hbm_to_vmem [thread:$0]  %s3587_s0, 512, %s28_s30, [#allocation4], %s3205_s22, %s3205_s22, %s3206_s23  }
  0x25   :  { %s3111_s3 = scalar_lea.vmem %s53_s13, 32  ;;  %p3116_p2 = scmp.lt.s32.totalorder %s53_s13, %s53_s13 }
  0x26   :  { %p3112_p1 = scmp.ne.s32.totalorder %s53_s13, %s3111_s3  ;;  %p3117_p3 = scmp.lt.s32.totalorder %s3111_s3, %s3111_s3 }
  0x28   :  { %p3118_p4 = por %p3117_p3, %p3116_p2 }
  0x2a   :  { %p3119_p5 = pnand %p3118_p4, %p3112_p1 }
  0x2c   :  { %3122 = shalt.err (!%p3119_p5)
}
  0x2d   :  { %55 = dma.hbm_to_vmem [thread:$0]  %s3589_s2, 32, %s53_s13, [#allocation8]  }
  0x2e   :  { %s3209_s18 = smov [#allocation12]   ;;  %s3210_s20 = smov [#allocation14]  }
  0x2f   :  { %s74_s19 = sshll.u32 %s3209_s18, 4  ;;  %s97_s21 = sshll.u32 %s3210_s20, 4  ;;  %s75_s19 = int_to_ptr.vmem [resolvable:$true] %s74_s19  ;;  %s98_s21 = int_to_ptr.vmem [resolvable:$true] %s97_s21 }
  0x30   :  { %s3131_s24 = scalar_lea.vmem %s75_s19, 32  ;;  %p3136_p7 = scmp.lt.s32.totalorder %s75_s19, %s75_s19 }
  0x31   :  { %p3132_p6 = scmp.ne.s32.totalorder %s75_s19, %s3131_s24  ;;  %p3137_p8 = scmp.lt.s32.totalorder %s3131_s24, %s3131_s24 }
  0x33   :  { %p3138_p9 = por %p3137_p8, %p3136_p7 }
  0x35   :  { %p3139_p10 = pnand %p3138_p9, %p3132_p6 }
  0x37   :  { %3142 = shalt.err (!%p3139_p10)
}
  0x38   :  { %77 = dma.hbm_to_vmem [thread:$0]  %s3591_s4, 32, %s75_s19, [#allocation11]  }
  0x39   :  { %s3211_s26 = smov [#allocation13]   ;;  %s3159_s2 = scalar_lea.vmem %s98_s21, 2048 }
  0x3a   :  { %87 = dma.hbm_to_smem %s3593_s6, 16, %s3211_s26, [#allocation6]  }
  0x3b   :  { %p3160_p11 = scmp.ne.s32.totalorder %s98_s21, %s3159_s2  ;;  %p3164_p12 = scmp.lt.s32.totalorder %s98_s21, %s98_s21 }
  0x3c   :  { %p3165_p13 = scmp.lt.s32.totalorder %s3159_s2, %s3159_s2 }
  0x3e   :  { %p3166_p0 = por %p3165_p13, %p3164_p12 }
  0x40   :  { %p3167_p1 = pnand %p3166_p0, %p3160_p11 }
  0x42   :  { %3170 = shalt.err (!%p3167_p1)
}
  0x43   :  { %s3212_s29 = smov 64   ;;  %s3213_s30 = smov 4  }
  0x44   :  { %103 = dma.hbm_to_vmem [thread:$0]  %s3596_s9, 2048, %s98_s21, [#allocation15], %s3212_s29, %s3212_s29, %s3213_s30  }
  0x45   :  { %3191 = dma.done.wait [#allocation4], 512  }
  0x46   :  { %3192 = vsyncadd [#allocation4], 4294966784 }
  0x47   :  { %3193 = dma.done.wait [#allocation8], 2080  }
  0x48   :  { %3194 = vsyncadd [#allocation8], 4294965216 }
  0x49   :  { %3195 = dma.done.wait [#allocation11], 20512  }
  0x4a   :  { %3196 = vsyncadd [#allocation11], 4294946784 }
  0x4b   :  { %3197 = dma.done.wait [#allocation6], 16  }
  0x4c   :  { %3198 = vsyncadd [#allocation6], 4294967280 }
  0x4d   :  { %3199 = dma.done.wait [#allocation15], 2048  }
  0x4e   :  { %3200 = vsyncadd [#allocation15], 4294965248 }
  0x4f   :  { %127 = sfence }
  0x50   :  { %v2671_v0 = vld [vmem:[#allocation7 + $0x74] ss:$8 sps:$4 sm:$0xff]   ;;  %v2673_v1 = vld [vmem:[#allocation7 + $0x70] ss:$8 sps:$4 sm:$0xff]   ;;  %v3214_v2 = vmov 0   ;;  %v129_v21 = vld [vmem:[#allocation3] sm:$0xff] }
  0x51   :  { %275 = vmatprep.mubr.bf16.mxu0 %v3214_v2  ;;  %243 = vmatprep.subr.bf16.mxu0 %v2671_v0  ;;  %v2674_v3 = vld [vmem:[#allocation7 + $0x64] ss:$8 sps:$4 sm:$0xff]   ;;  %v2676_v4 = vld [vmem:[#allocation7 + $0x60] ss:$8 sps:$4 sm:$0xff]   ;;  %v2677_v5 = vld [vmem:[#allocation7 + $0x54] ss:$8 sps:$4 sm:$0xff]  }
  0x52   :  { %244 = vmatpush1.bf16.msra.mxu0 %v2673_v1  ;;  %v2679_v6 = vld [vmem:[#allocation7 + $0x50] ss:$8 sps:$4 sm:$0xff]   ;;  %v2680_v7 = vld [vmem:[#allocation7 + $0x44] ss:$8 sps:$4 sm:$0xff]   ;;  %v2682_v8 = vld [vmem:[#allocation7 + $0x40] ss:$8 sps:$4 sm:$0xff]  }
  0x53   :  { %245 = vmatprep.subr.bf16.mxu0 %v2674_v3  ;;  %v2683_v9 = vld [vmem:[#allocation7 + $0x34] ss:$8 sps:$4 sm:$0xff]   ;;  %v2685_v12 = vld [vmem:[#allocation7 + $0x30] ss:$8 sps:$4 sm:$0xff]   ;;  %v2703_v14 = vld [vmem:[#allocation10 + $0x60] ss:$8 sps:$4 sm:$0xff]  }
  0x54   :  { %v2695_v10 = vld [vmem:[#allocation10 + $0x74] ss:$8 sps:$4 sm:$0xff]   ;;  %v2697_v11 = vld [vmem:[#allocation10 + $0x70] ss:$8 sps:$4 sm:$0xff]   ;;  %v2701_v13 = vld [vmem:[#allocation10 + $0x64] ss:$8 sps:$4 sm:$0xff]  }
  0x55   :  { %1605 = vmatprep.subr.bf16.mxu1 %v2695_v10  ;;  %v2686_v15 = vld [vmem:[#allocation7 + $0x24] ss:$8 sps:$4 sm:$0xff]   ;;  %v2688_v16 = vld [vmem:[#allocation7 + $0x20] ss:$8 sps:$4 sm:$0xff]   ;;  %v2689_v17 = vld [vmem:[#allocation7 + $0x14] ss:$8 sps:$4 sm:$0xff]  }
  0x56   :  { %246 = vmatpush1.bf16.msra.mxu0 %v2676_v4  ;;  %1606 = vmatpush1.bf16.msra.mxu1 %v2697_v11  ;;  %v2691_v18 = vld [vmem:[#allocation7 + $0x10] ss:$8 sps:$4 sm:$0xff]   ;;  %v2692_v19 = vld [vmem:[#allocation7 + $0x4] ss:$8 sps:$4 sm:$0xff]   ;;  %v2694_v20 = vld [vmem:[#allocation7] ss:$8 sps:$4 sm:$0xff]  }
  0x57   :  { %247 = vmatprep.subr.bf16.mxu0 %v2677_v5  ;;  %1607 = vmatprep.subr.bf16.mxu1 %v2701_v13  ;;  %v130_v22 = vld [vmem:[#allocation3 + $0x8] sm:$0xff]  ;;  %v2700_v23 = vld [vmem:[#allocation10 + $0x174] ss:$8 sps:$4 sm:$0xff]   ;;  %v2698_v24 = vld [vmem:[#allocation10 + $0x170] ss:$8 sps:$4 sm:$0xff]   ;;  %v3215_v11 = vmov 0.0  }
  0x58   :  { %v133_v25 = vpack.c.bf16 %v130_v22, %v129_v21  ;;  %v2706_v26 = vld [vmem:[#allocation10 + $0x164] ss:$8 sps:$4 sm:$0xff]   ;;  %v132_v28 = vld [vmem:[#allocation3 + $0x18] sm:$0xff]  ;;  %v2704_v29 = vld [vmem:[#allocation10 + $0x160] ss:$8 sps:$4 sm:$0xff]   ;;  %vm360_vm0 = vcmask 1041408  }
  0x59   :  { %v131_v27 = vld [vmem:[#allocation3 + $0x10] sm:$0xff]  ;;  %v2715_v34 = vld [vmem:[#allocation10 + $0x40] ss:$8 sps:$4 sm:$0xff]   ;;  %353 = vst [vmem:[#allocation2] sm:$0x3] %v3215_v11  ;;  %vm462_vm1 = vcmask 1045504  }
  0x5a   :  { %248 = vmatpush1.bf16.msra.mxu0 %v2679_v6  ;;  %1608 = vmatpush1.bf16.msra.mxu1 %v2703_v14  ;;  %v134_v30 = vpack.c.bf16 %v132_v28, %v131_v27  ;;  %v2707_v31 = vld [vmem:[#allocation10 + $0x54] ss:$8 sps:$4 sm:$0xff]   ;;  %v2709_v32 = vld [vmem:[#allocation10 + $0x50] ss:$8 sps:$4 sm:$0xff]   ;;  %v2713_v33 = vld [vmem:[#allocation10 + $0x44] ss:$8 sps:$4 sm:$0xff]  }
  0x5b   :  { %249 = vmatprep.subr.bf16.mxu0 %v2680_v7  ;;  %1609 = vmatprep.subr.bf16.mxu1 %v2707_v31  ;;  %v2712_v35 = vld [vmem:[#allocation10 + $0x154] ss:$8 sps:$4 sm:$0xff]   ;;  %v2710_v36 = vld [vmem:[#allocation10 + $0x150] ss:$8 sps:$4 sm:$0xff]   ;;  %v2718_v39 = vld [vmem:[#allocation10 + $0x144] ss:$8 sps:$4 sm:$0xff]  }
  0x5c   :  { %v2719_v37 = vld [vmem:[#allocation10 + $0x34] ss:$8 sps:$4 sm:$0xff]   ;;  %v2721_v38 = vld [vmem:[#allocation10 + $0x30] ss:$8 sps:$4 sm:$0xff]   ;;  %v2716_v40 = vld [vmem:[#allocation10 + $0x140] ss:$8 sps:$4 sm:$0xff]  }
  0x5d   :  { %v2725_v41 = vld [vmem:[#allocation10 + $0x24] ss:$8 sps:$4 sm:$0xff]   ;;  %v2727_v42 = vld [vmem:[#allocation10 + $0x20] ss:$8 sps:$4 sm:$0xff]   ;;  %v2724_v43 = vld [vmem:[#allocation10 + $0x134] ss:$8 sps:$4 sm:$0xff]  }
  0x5e   :  { %250 = vmatpush1.bf16.msra.mxu0 %v2682_v8  ;;  %1610 = vmatpush1.bf16.msra.mxu1 %v2709_v32  ;;  %v2722_v44 = vld [vmem:[#allocation10 + $0x130] ss:$8 sps:$4 sm:$0xff]   ;;  %v2731_v45 = vld [vmem:[#allocation10 + $0x14] ss:$8 sps:$4 sm:$0xff]   ;;  %v2730_v47 = vld [vmem:[#allocation10 + $0x124] ss:$8 sps:$4 sm:$0xff]  }
  0x5f   :  { %251 = vmatprep.subr.bf16.mxu0 %v2683_v9  ;;  %1611 = vmatprep.subr.bf16.mxu1 %v2713_v33  ;;  %v2733_v46 = vld [vmem:[#allocation10 + $0x10] ss:$8 sps:$4 sm:$0xff]   ;;  %v2728_v48 = vld [vmem:[#allocation10 + $0x120] ss:$8 sps:$4 sm:$0xff]   ;;  %v2737_v49 = vld [vmem:[#allocation10 + $0x4] ss:$8 sps:$4 sm:$0xff]  }
  0x60   :  { %v2739_v50 = vld [vmem:[#allocation10] ss:$8 sps:$4 sm:$0xff]   ;;  %v2736_v51 = vld [vmem:[#allocation10 + $0x114] ss:$8 sps:$4 sm:$0xff]   ;;  %v2734_v52 = vld [vmem:[#allocation10 + $0x110] ss:$8 sps:$4 sm:$0xff]  }
  0x61   :  { %v2743_v53 = vld [vmem:[#allocation10 + $0xf4] ss:$8 sps:$4 sm:$0xff]   ;;  %v2745_v54 = vld [vmem:[#allocation10 + $0xf0] ss:$8 sps:$4 sm:$0xff]   ;;  %v2742_v55 = vld [vmem:[#allocation10 + $0x104] ss:$8 sps:$4 sm:$0xff]  }
  0x62   :  { %252 = vmatpush1.bf16.msra.mxu0 %v2685_v12  ;;  %1612 = vmatpush1.bf16.msra.mxu1 %v2715_v34  ;;  %v2740_v56 = vld [vmem:[#allocation10 + $0x100] ss:$8 sps:$4 sm:$0xff]   ;;  %v2749_v57 = vld [vmem:[#allocation10 + $0xe4] ss:$8 sps:$4 sm:$0xff]   ;;  %v2748_v59 = vld [vmem:[#allocation10 + $0x1f4] ss:$8 sps:$4 sm:$0xff]  }
  0x63   :  { %253 = vmatprep.subr.bf16.mxu0 %v2686_v15  ;;  %1613 = vmatprep.subr.bf16.mxu1 %v2719_v37  ;;  %v2751_v58 = vld [vmem:[#allocation10 + $0xe0] ss:$8 sps:$4 sm:$0xff]   ;;  %v2746_v60 = vld [vmem:[#allocation10 + $0x1f0] ss:$8 sps:$4 sm:$0xff]   ;;  %v2755_v61 = vld [vmem:[#allocation10 + $0xd4] ss:$8 sps:$4 sm:$0xff]  }
  0x64   :  { %v2757_v62 = vld [vmem:[#allocation10 + $0xd0] ss:$8 sps:$4 sm:$0xff]   ;;  %v2754_v63 = vld [vmem:[#allocation10 + $0x1e4] ss:$8 sps:$4 sm:$0xff]   ;;  %v2752_v0 = vld [vmem:[#allocation10 + $0x1e0] ss:$8 sps:$4 sm:$0xff]  }
  0x65   :  { %v2761_v1 = vld [vmem:[#allocation10 + $0xc4] ss:$8 sps:$4 sm:$0xff]   ;;  %v2760_v3 = vld [vmem:[#allocation10 + $0x1d4] ss:$8 sps:$4 sm:$0xff]   ;;  %v2758_v4 = vld [vmem:[#allocation10 + $0x1d0] ss:$8 sps:$4 sm:$0xff]  }
  0x66   :  { %254 = vmatpush1.bf16.msra.mxu0 %v2688_v16  ;;  %1614 = vmatpush1.bf16.msra.mxu1 %v2721_v38  ;;  %v2767_v5 = vld [vmem:[#allocation10 + $0xb4] ss:$8 sps:$4 sm:$0xff]   ;;  %v2769_v6 = vld [vmem:[#allocation10 + $0xb0] ss:$8 sps:$4 sm:$0xff]   ;;  %v2766_v7 = vld [vmem:[#allocation10 + $0x1c4] ss:$8 sps:$4 sm:$0xff]  }
  0x67   :  { %255 = vmatprep.subr.bf16.mxu0 %v2689_v17  ;;  %1615 = vmatprep.subr.bf16.mxu1 %v2725_v41  ;;  %v2764_v8 = vld [vmem:[#allocation10 + $0x1c0] ss:$8 sps:$4 sm:$0xff]   ;;  %v2773_v9 = vld [vmem:[#allocation10 + $0xa4] ss:$8 sps:$4 sm:$0xff]   ;;  %352 = vst [vmem:[#allocation2 + $0x40] sm:$0x3] %v3215_v11 }
  0x68   :  { %v2775_v10 = vld [vmem:[#allocation10 + $0xa0] ss:$8 sps:$4 sm:$0xff]   ;;  %354 = vst [vmem:[#allocation2 + $0x28] sm:$0xc] %v3215_v11  ;;  %355 = vst [vmem:[#allocation2 + $0x20] sm:$0xc] %v3215_v11 }
  0x69   :  { %454 = vst [vmem:[#allocation2 + $0x28] sm:$0x30] %v3215_v11  ;;  %455 = vst [vmem:[#allocation2 + $0x20] sm:$0x30] %v3215_v11  ;;  %v2772_v12 = vld [vmem:[#allocation10 + $0x1b4] ss:$8 sps:$4 sm:$0xff]  }
  0x6a   :  { %256 = vmatpush1.bf16.msra.mxu0 %v2691_v18  ;;  %1616 = vmatpush1.bf16.msra.mxu1 %v2727_v42  ;;  %456 = vst [vmem:[#allocation2 + $0x8] sm:$0xc0] %v3215_v11  ;;  %457 = vst [vmem:[#allocation2 + $0x10] sm:$0xc0] %v3215_v11  ;;  %v2770_v13 = vld [vmem:[#allocation10 + $0x1b0] ss:$8 sps:$4 sm:$0xff]  }
  0x6b   :  { %257 = vmatprep.subr.bf16.mxu0 %v2692_v19  ;;  %1617 = vmatprep.subr.bf16.mxu1 %v2731_v45  ;;  %v2779_v14 = vld [vmem:[#allocation10 + $0x94] ss:$8 sps:$4 sm:$0xff]   ;;  %v2781_v15 = vld [vmem:[#allocation10 + $0x90] ss:$8 sps:$4 sm:$0xff]   ;;  %v2778_v16 = vld [vmem:[#allocation10 + $0x1a4] ss:$8 sps:$4 sm:$0xff]  }
  0x6c   :  { %v2776_v17 = vld [vmem:[#allocation10 + $0x1a0] ss:$8 sps:$4 sm:$0xff]   ;;  %v2785_v18 = vld [vmem:[#allocation10 + $0x84] ss:$8 sps:$4 sm:$0xff]   ;;  %v2782_v21 = vld [vmem:[#allocation10 + $0x190] ss:$8 sps:$4 sm:$0xff]  }
  0x6d   :  { %v2787_v19 = vld [vmem:[#allocation10 + $0x80] ss:$8 sps:$4 sm:$0xff]   ;;  %v2793_v22 = vld [vmem:[#allocation10 + $0x274] ss:$8 sps:$4 sm:$0xff]   ;;  %vm439_vm2 = vcmask 1043456   ;;  %vm401_vm3 = vcmask 1046528  }
  0x6e   :  { %258 = vmatpush1.bf16.msra.mxu0 %v2694_v20  ;;  %1618 = vmatpush1.bf16.msra.mxu1 %v2733_v46  ;;  %v2784_v20 = vld [vmem:[#allocation10 + $0x194] ss:$8 sps:$4 sm:$0xff]   ;;  %vm420_vm4 = vcmask 1044480   ;;  %vm1959_vm5 = vcmask 1040384   ;;  %s2605_s9 = sld [smem:[#allocation13 + $0x1]] }
  0x6f   :  { %1658 = vmatprep.subr.bf16.mxu0 %v2700_v23  ;;  %1619 = vmatprep.subr.bf16.mxu1 %v2737_v49  ;;  %v2790_v23 = vld [vmem:[#allocation10 + $0x184] ss:$8 sps:$4 sm:$0xff]  }
  0x71   :  { %276 = vmatmul.mubr.bf16.vlgmr.msra.gmra.mxu0 %v133_v25  ;;  %v2796_v25 = vld [vmem:[#allocation10 + $0x374] ss:$8 sps:$4 sm:$0xff]  }
  0x72   :  { %285 = vmatprep.mubr.bf16.mxu0 %v3214_v2  ;;  %1659 = vmatpush1.bf16.msra.mxu0 %v2698_v24  ;;  %v2763_v2 = vld [vmem:[#allocation10 + $0xc0] ss:$8 sps:$4 sm:$0xff]  }
  0x73   :  { %1660 = vmatprep.subr.bf16.mxu0 %v2706_v26  ;;  %1620 = vmatpush1.bf16.msra.mxu1 %v2739_v50  ;;  %v2788_v24 = vld [vmem:[#allocation10 + $0x180] ss:$8 sps:$4 sm:$0xff]   ;;  %v153_v26 = vlaneseq }
  0x74   :  { %1621 = vmatprep.subr.bf16.mxu1 %v2743_v53 }
  0x75   :  { %v3308_v27 = vshrl.u32 %v153_v26, 7 }
  0x76   :  { %1661 = vmatpush1.bf16.msra.mxu0 %v2704_v29  ;;  %v151_v29 = vld [vmem:[#allocation9] sm:$0x3] }
  0x77   :  { %1662 = vmatprep.subr.bf16.mxu0 %v2712_v35  ;;  %1622 = vmatpush2.bf16.msra.mxu1 %v2745_v54  ;;  %v3311_v28 = vsub.s32 0, %v3308_v27 }
  0x78   :  { %1623 = vmatprep.subr.bf16.mxu1 %v2749_v57 }
  0x79   :  { %286 = vmatmul.mubr.bf16.gmra.mxu0 %v134_v30  ;;  %v3314_v30 = vsub.s32 1, %v3308_v27  ;;  %v156_v31 = vrot.slane %v151_v29, %v3311_v28 }
  0x7a   :  { %1663 = vmatpush1.bf16.msra.mxu0 %v2710_v36 }
  0x7b   :  { %1664 = vmatprep.subr.bf16.mxu0 %v2718_v39  ;;  %1624 = vmatpush2.bf16.msra.mxu1 %v2751_v58  ;;  %v160_v32 = vrot.slane %v151_v29, %v3314_v30 }
  0x7c   :  { %1625 = vmatprep.subr.bf16.mxu1 %v2755_v61 }
  0x7e   :  { %1665 = vmatpush1.bf16.msra.mxu0 %v2716_v40 }
  0x7f   :  { %1666 = vmatprep.subr.bf16.mxu0 %v2724_v43  ;;  %1626 = vmatpush2.bf16.msra.mxu1 %v2757_v62 }
  0x80   :  { %1627 = vmatprep.subr.bf16.mxu1 %v2761_v1 }
  0x82   :  { %1667 = vmatpush1.bf16.msra.mxu0 %v2722_v44 }
  0x83   :  { %1668 = vmatprep.subr.bf16.mxu0 %v2730_v47  ;;  %1628 = vmatpush2.bf16.msra.mxu1 %v2763_v2 }
  0x84   :  { %1629 = vmatprep.subr.bf16.mxu1 %v2767_v5 }
  0x86   :  { %1669 = vmatpush1.bf16.msra.mxu0 %v2728_v48 }
  0x87   :  { %1670 = vmatprep.subr.bf16.mxu0 %v2736_v51  ;;  %1630 = vmatpush2.bf16.msra.mxu1 %v2769_v6 }
  0x88   :  { %1631 = vmatprep.subr.bf16.mxu1 %v2773_v9 }
  0x8a   :  { %1671 = vmatpush1.bf16.msra.mxu0 %v2734_v52 }
  0x8b   :  { %1672 = vmatprep.subr.bf16.mxu0 %v2742_v55  ;;  %1632 = vmatpush2.bf16.msra.mxu1 %v2775_v10 }
  0x8c   :  { %1633 = vmatprep.subr.bf16.mxu1 %v2779_v14 }
  0x8e   :  { %1673 = vmatpush1.bf16.msra.mxu0 %v2740_v56 }
  0x8f   :  { %1674 = vmatprep.subr.bf16.mxu0 %v2748_v59  ;;  %1634 = vmatpush2.bf16.msra.mxu1 %v2781_v15 }
  0x90   :  { %1635 = vmatprep.subr.bf16.mxu1 %v2785_v18 }
  0x92   :  { %1675 = vmatpush2.bf16.msra.mxu0 %v2746_v60 }
  0x93   :  { %1676 = vmatprep.subr.bf16.mxu0 %v2754_v63  ;;  %1636 = vmatpush2.bf16.msra.mxu1 %v2787_v19 }
  0x94   :  { %1711 = vmatprep.subr.bf16.mxu1 %v2793_v22 }
  0x96   :  { %1677 = vmatpush2.bf16.msra.mxu0 %v2752_v0 }
  0x97   :  { %1678 = vmatprep.subr.bf16.mxu0 %v2760_v3 }
  0x9a   :  { %1679 = vmatpush2.bf16.msra.mxu0 %v2758_v4 }
  0x9b   :  { %1680 = vmatprep.subr.bf16.mxu0 %v2766_v7 }
  0x9e   :  { %1681 = vmatpush2.bf16.msra.mxu0 %v2764_v8 }
  0x9f   :  { %1682 = vmatprep.subr.bf16.mxu0 %v2772_v12 }
  0xa2   :  { %1683 = vmatpush2.bf16.msra.mxu0 %v2770_v13 }
  0xa3   :  { %1684 = vmatprep.subr.bf16.mxu0 %v2778_v16 }
  0xa6   :  { %1685 = vmatpush2.bf16.msra.mxu0 %v2776_v17 }
  0xa7   :  { %1686 = vmatprep.subr.bf16.mxu0 %v2784_v20 }
  0xaa   :  { %1687 = vmatpush2.bf16.msra.mxu0 %v2782_v21 }
  0xab   :  { %1688 = vmatprep.subr.bf16.mxu0 %v2790_v23 }
  0xae   :  { %1689 = vmatpush2.bf16.msra.mxu0 %v2788_v24 }
  0xaf   :  { %1764 = vmatprep.subr.bf16.mxu0 %v2796_v25 }
 0x131   :  { %v277_v33 = vpop.f32.mrf.mxu0 }
 0x132   :  { %v278_v34 = vadd.f32 %v277_v33, %v156_v31 }
 0x133   :  { %v279_v35 = vpop.f32.mrf.mxu0 }
 0x134   :  { %v2428_v36 = vmul.f32 -1.442695, %v278_v34  ;;  %v280_v37 = vadd.f32 %v279_v35, %v160_v32 }
 0x135   :  { %v281_v38 = vpop.f32.mrf.mxu0 }
 0x136   :  { %2951 = vpow2.f32 %v2428_v36  ;;  %v2429_v39 = vmul.f32 -1.442695, %v280_v37  ;;  %v282_v40 = vadd.f32 %v281_v38, %v156_v31 }
 0x137   :  { %v283_v41 = vpop.f32.mrf.mxu0 }
 0x138   :  { %2953 = vpow2.f32 %v2429_v39  ;;  %v2430_v42 = vmul.f32 -1.442695, %v282_v40  ;;  %v284_v43 = vadd.f32 %v283_v41, %v160_v32 }
 0x139   :  { %v287_v44 = vpop.f32.mrf.mxu0 }
 0x13a   :  { %2955 = vpow2.f32 %v2430_v42  ;;  %v2431_v45 = vmul.f32 -1.442695, %v284_v43  ;;  %v288_v46 = vadd.f32 %v287_v44, %v156_v31 }
 0x13b   :  { %v289_v47 = vpop.f32.mrf.mxu0 }
 0x13c   :  { %2957 = vpow2.f32 %v2431_v45  ;;  %v2432_v48 = vmul.f32 -1.442695, %v288_v46  ;;  %v290_v49 = vadd.f32 %v289_v47, %v160_v32  ;;  %v2791_v45 = vld [vmem:[#allocation10 + $0x270] ss:$8 sps:$4 sm:$0xff]  }
 0x13d   :  { %v291_v50 = vpop.f32.mrf.mxu0 }
 0x13e   :  { %2959 = vpow2.f32 %v2432_v48  ;;  %v2433_v51 = vmul.f32 -1.442695, %v290_v49  ;;  %v292_v52 = vadd.f32 %v291_v50, %v156_v31 }
 0x13f   :  { %v293_v53 = vpop.f32.mrf.mxu0 }
 0x140   :  { %2961 = vpow2.f32 %v2433_v51  ;;  %v2434_v54 = vmul.f32 -1.442695, %v292_v52  ;;  %v3318_v55 = vadd.f32 %v293_v53, %v160_v32  ;;  %v2799_v53 = vld [vmem:[#allocation10 + $0x264] ss:$8 sps:$4 sm:$0xff]  }
 0x142   :  { %2963 = vpow2.f32 %v2434_v54  ;;  %v2435_v56 = vmul.f32 -1.442695, %v3318_v55 }
 0x143   :  { %v2952_v57 = vpop.eup %2951 }
 0x144   :  { %v320_v58 = vadd.f32 1.0, %v2952_v57  ;;  %2965 = vpow2.f32 %v2435_v56 }
 0x145   :  { %v2954_v59 = vpop.eup %2953 }
 0x146   :  { %2967 = vrcp.f32 %v320_v58  ;;  %v321_v60 = vadd.f32 1.0, %v2954_v59 }
 0x147   :  { %v2956_v61 = vpop.eup %2955 }
 0x148   :  { %2969 = vrcp.f32 %v321_v60  ;;  %v322_v62 = vadd.f32 1.0, %v2956_v61  ;;  %v2797_v61 = vld [vmem:[#allocation10 + $0x260] ss:$8 sps:$4 sm:$0xff]  }
 0x149   :  { %v2958_v63 = vpop.eup %2957 }
 0x14a   :  { %2971 = vrcp.f32 %v322_v62  ;;  %v323_v0 = vadd.f32 1.0, %v2958_v63 }
 0x14b   :  { %v2960_v1 = vpop.eup %2959 }
 0x14c   :  { %2973 = vrcp.f32 %v323_v0  ;;  %v324_v2 = vadd.f32 1.0, %v2960_v1  ;;  %v2794_v0 = vld [vmem:[#allocation10 + $0x370] ss:$8 sps:$4 sm:$0xff]  }
 0x14d   :  { %v2962_v3 = vpop.eup %2961 }
 0x14e   :  { %2975 = vrcp.f32 %v324_v2  ;;  %v325_v4 = vadd.f32 1.0, %v2962_v3 }
 0x14f   :  { %v2964_v5 = vpop.eup %2963 }
 0x150   :  { %2977 = vrcp.f32 %v325_v4  ;;  %v326_v6 = vadd.f32 1.0, %v2964_v5 }
 0x151   :  { %v2966_v7 = vpop.eup %2965 }
 0x152   :  { %2979 = vrcp.f32 %v326_v6  ;;  %v327_v8 = vadd.f32 1.0, %v2966_v7  ;;  %v2802_v6 = vld [vmem:[#allocation10 + $0x364] ss:$8 sps:$4 sm:$0xff]   ;;  %v2805_v7 = vld [vmem:[#allocation10 + $0x254] ss:$8 sps:$4 sm:$0xff]  }
 0x153   :  { %v2968_v9 = vpop.eup %2967 }
 0x154   :  { %v3321_v10 = vmul.f32 %v2968_v9, %v278_v34  ;;  %2981 = vrcp.f32 %v327_v8 }
 0x155   :  { %v2970_v11 = vpop.eup %2969 }
 0x156   :  { %v361_v12 = vrot.slane %v3321_v10, 6  ;;  %v3324_v13 = vmul.f32 %v2970_v11, %v280_v37 }
 0x157   :  { %v2972_v14 = vpop.eup %2971 }
 0x158   :  { %373 = vst [vmem:[#allocation2 + $0x40] sm:$0xfc] %v361_v12  ;;  %v362_v15 = vrot.slane %v3324_v13, 6  ;;  %v3327_v16 = vmul.f32 %v2972_v14, %v282_v40 }
 0x159   :  { %v2974_v17 = vpop.eup %2973 }
 0x15a   :  { %374 = vst [vmem:[#allocation2] sm:$0xfc] %v362_v15  ;;  %v363_v18 = vrot.slane %v3327_v16, 6  ;;  %v617_v19 = vpack.c.bf16 %v3327_v16, %v3321_v10  ;;  %v3332_v20 = vmul.f32 %v2974_v17, %v284_v43 }
 0x15b   :  { %v2976_v21 = vpop.eup %2975 }
 0x15c   :  { %v3334_v22 = vsel %vm360_vm0, %v361_v12, %v363_v18  ;;  %377 = vst [vmem:[#allocation2 + $0x28] sm:$0x3] %v363_v18  ;;  %v365_v23 = vrot.slane %v3332_v20, 6  ;;  %v348_v24 = vmul.f32 %v2976_v21, %v288_v46  ;;  %v2803_v12 = vld [vmem:[#allocation10 + $0x250] ss:$8 sps:$4 sm:$0xff]  }
 0x15d   :  { %v2978_v25 = vpop.eup %2977  ;;  %v403_v46 = vrot.slane %v3334_v22, 1 }
 0x15e   :  { %v3337_v26 = vsel %vm360_vm0, %v362_v15, %v365_v23  ;;  %378 = vst [vmem:[#allocation2 + $0x20] sm:$0x3] %v365_v23  ;;  %v463_v29 = vrot.slane %v348_v24, 2  ;;  %v3339_v31 = vmul.f32 %v2978_v25, %v290_v49  ;;  %v513_v33 = vrot.slane %v348_v24, 4 }
 0x15f   :  { %v2980_v32 = vpop.eup %2979  ;;  %v379_v36 = vld [vmem:[#allocation2 + $0x40] sm:$0xff]  ;;  %v406_v59 = vrot.slane %v3337_v26, 1  ;;  %v425_v63 = vrot.slane %v3337_v26, 3 }
 0x160   :  { %475 = vst [vmem:[#allocation2 + $0x28] sm:$0xc0] %v463_v29  ;;  %v464_v34 = vrot.slane %v3339_v31, 2  ;;  %v350_v35 = vmul.f32 %v2980_v32, %v292_v52  ;;  %v383_v43 = vld [vmem:[#allocation2 + $0x40] sm:$0xfe]  ;;  %v613_v47 = vpack.c.bf16 %v3334_v22, %v379_v36  ;;  %v3361_v62 = vrot.slane %v513_v33, 4 }
 0x161   :  { %v2982_v37 = vpop.eup %2981  ;;  %v380_v38 = vld [vmem:[#allocation2] sm:$0xff]  ;;  %v2800_v32 = vld [vmem:[#allocation10 + $0x360] ss:$8 sps:$4 sm:$0xff]  }
 0x162   :  { %v384_v39 = vld [vmem:[#allocation2] sm:$0xfe]  ;;  %476 = vst [vmem:[#allocation2 + $0x20] sm:$0xc0] %v464_v34  ;;  %v465_v40 = vrot.slane %v350_v35, 2  ;;  %v515_v41 = vrot.slane %v350_v35, 4  ;;  %v3343_v42 = vmul.f32 %v2982_v37, %v3318_v55  ;;  %v614_v44 = vpack.c.bf16 %v3337_v26, %v380_v38 }
 0x163   :  { %v385_v48 = vld [vmem:[#allocation2 + $0x28] sm:$0x1]  ;;  %v405_v52 = vrot.slane %v384_v39, 1  ;;  %v402_v55 = vrot.slane %v383_v43, 1  ;;  %v3355_v57 = vld [vmem:[#allocation2] sm:$0xf8] }
 0x164   :  { %v3349_v49 = vsel %vm462_vm1, %v463_v29, %v465_v40  ;;  %479 = vst [vmem:[#allocation2 + $0x8] sm:$0x3f] %v465_v40  ;;  %v3352_v50 = vsel %vm439_vm2, %v513_v33, %v515_v41  ;;  %v467_v51 = vrot.slane %v3343_v42, 2  ;;  %1637 = vmatprep.mubr.bf16.mxu1 %v614_v44  ;;  %v408_v56 = vrot.slane %v385_v48, 1  ;;  %v2811_v40 = vld [vmem:[#allocation10 + $0x244] ss:$8 sps:$4 sm:$0xff]  }
 0x165   :  { %v386_v54 = vld [vmem:[#allocation2 + $0x20] sm:$0x1]  ;;  %1638 = vmatmul.mubr.bf16.vlgmr.msra.gmra.mxu1 %v613_v47  ;;  %v3365_v3 = vrot.slane %v515_v41, 4  ;;  %v407_v4 = vsel %vm401_vm3, %v405_v52, %v406_v59  ;;  %v424_v8 = vrot.slane %v3355_v57, 3  ;;  %v404_v11 = vsel %vm401_vm3, %v402_v55, %v403_v46  ;;  %v2808_v52 = vld [vmem:[#allocation10 + $0x354] ss:$8 sps:$4 sm:$0xff]  }
 0x166   :  { %v3358_v58 = vsel %vm462_vm1, %v464_v34, %v467_v51  ;;  %480 = vst [vmem:[#allocation2 + $0x10] sm:$0x3f] %v467_v51  ;;  %v410_v60 = vrot.slane %v386_v54, 1  ;;  %1712 = vmatpush1.bf16.msra.mxu1 %v2791_v45  ;;  %v409_v1 = vsel %vm401_vm3, %v403_v46, %v408_v56  ;;  %v504_v18 = vrot.slane %v3349_v49, 1  ;;  %v390_v29 = vld [vmem:[#allocation2 + $0x20] sm:$0x7] }
 0x167   :  { %v487_v2 = vld [vmem:[#allocation2 + $0x28] sm:$0xe0]  ;;  %1713 = vmatprep.subr.bf16.mxu1 %v2799_v53  ;;  %v615_v21 = vpack.c.bf16 %v409_v1, %v404_v11  ;;  %v507_v25 = vrot.slane %v3358_v58, 1  ;;  %v3374_v33 = vrot.slane %v3358_v58, 4  ;;  %v556_v37 = vrot.slane %v3352_v50, 4 }
 0x168   :  { %v411_v5 = vsel %vm401_vm3, %v406_v59, %v410_v60  ;;  %v503_v17 = vrot.slane %v487_v2, 1  ;;  %v481_v23 = vld [vmem:[#allocation2 + $0x28] sm:$0xf0]  ;;  %v3378_v38 = vrot.slane %v3349_v49, 4  ;;  %v618_v45 = vpack.c.bf16 %v3332_v20, %v3324_v13  ;;  %v2809_v13 = vld [vmem:[#allocation10 + $0x240] ss:$8 sps:$4 sm:$0xff]  }
 0x169   :  { %v616_v9 = vpack.c.bf16 %v411_v5, %v407_v4  ;;  %v482_v14 = vld [vmem:[#allocation2 + $0x20] sm:$0xf0]  ;;  %v545_v44 = vrot.slane %v481_v23, 4  ;;  %v429_v48 = vrot.slane %v390_v29, 3 }
 0x16a   :  { %v488_v15 = vld [vmem:[#allocation2 + $0x20] sm:$0xe0]  ;;  %1714 = vmatpush1.bf16.msra.mxu1 %v2797_v61  ;;  %v547_v34 = vrot.slane %v482_v14, 4  ;;  %v505_v47 = vsel %vm401_vm3, %v503_v17, %v504_v18  ;;  %v2814_v17 = vld [vmem:[#allocation10 + $0x344] ss:$8 sps:$4 sm:$0xff]  }
 0x16b   :  { %v506_v24 = vrot.slane %v488_v15, 1  ;;  %1690 = vmatprep.mubr.bf16.mxu0 %v616_v9  ;;  %v485_v35 = vld [vmem:[#allocation2 + $0x8] sm:$0xf]  ;;  %1715 = vmatprep.subr.bf16.mxu1 %v2805_v7  ;;  %v549_v2 = vrot.slane %v505_v47, 4  ;;  %v546_v7 = vsel %vm439_vm2, %v545_v44, %v3378_v38  ;;  %v2821_v44 = vld [vmem:[#allocation10 + $0x220] ss:$8 sps:$4 sm:$0xff]  }
 0x16c   :  { %v489_v36 = vld [vmem:[#allocation2 + $0x8] sm:$0x1f]  ;;  %1691 = vmatmul.mubr.bf16.vlgmr.msra.gmra.mxu0 %v615_v21  ;;  %v573_v39 = vrot.slane %v485_v35, 4  ;;  %v548_v56 = vsel %vm439_vm2, %v547_v34, %v3374_v33  ;;  %v491_v34 = vld [vmem:[#allocation2 + $0x28] sm:$0x80] }
 0x16d   :  { %v509_v41 = vrot.slane %v489_v36, 1  ;;  %1765 = vmatpush1.bf16.msra.mxu0 %v2794_v0  ;;  %v486_v43 = vld [vmem:[#allocation2 + $0x10] sm:$0xf]  ;;  %v508_v53 = vsel %vm401_vm3, %v506_v24, %v507_v25  ;;  %v2815_v24 = vld [vmem:[#allocation10 + $0x230] ss:$8 sps:$4 sm:$0xff]   ;;  %v523_v47 = vrot.slane %v491_v34, 3 }
 0x16e   :  { %v490_v46 = vld [vmem:[#allocation2 + $0x10] sm:$0x1f]  ;;  %1766 = vmatprep.subr.bf16.mxu0 %v2802_v6  ;;  %v575_v51 = vrot.slane %v486_v43, 4  ;;  %1716 = vmatpush1.bf16.msra.mxu1 %v2803_v12  ;;  %v574_v59 = vsel %vm439_vm2, %v3378_v38, %v573_v39  ;;  %v2806_v6 = vld [vmem:[#allocation10 + $0x350] ss:$8 sps:$4 sm:$0xff]   ;;  %v552_v9 = vrot.slane %v508_v53, 4 }
 0x16f   :  { %v511_v54 = vrot.slane %v490_v46, 1  ;;  %v510_v55 = vsel %vm401_vm3, %v504_v18, %v509_v41  ;;  %v577_v60 = vrot.slane %v509_v41, 4  ;;  %1717 = vmatprep.subr.bf16.mxu1 %v2811_v40  ;;  %v2817_v4 = vld [vmem:[#allocation10 + $0x234] ss:$8 sps:$4 sm:$0xff]   ;;  %v623_v12 = vpack.c.bf16 %v574_v59, %v546_v7  ;;  %v2812_v39 = vld [vmem:[#allocation10 + $0x340] ss:$8 sps:$4 sm:$0xff]  }
 0x170   :  { %v550_v20 = vrot.slane %v510_v55, 4  ;;  %v576_v61 = vsel %vm439_vm2, %v3374_v33, %v575_v51  ;;  %v430_v18 = vsel %vm420_vm4, %v425_v63, %v429_v48  ;;  %v493_v35 = vld [vmem:[#allocation2 + $0x8] sm:$0x7f]  ;;  %v426_v40 = vsel %vm420_vm4, %v424_v8, %v425_v63  ;;  %v391_v41 = vld [vmem:[#allocation2 + $0x40] sm:$0xf0]  ;;  %v496_v50 = vld [vmem:[#allocation2 + $0x10] sm:$0xff] }
 0x171   :  { %v512_v0 = vsel %vm401_vm3, %v507_v25, %v511_v54  ;;  %v579_v1 = vrot.slane %v511_v54, 4  ;;  %1767 = vmatpush1.bf16.msra.mxu0 %v2800_v32  ;;  %v624_v5 = vpack.c.bf16 %v576_v61, %v548_v56  ;;  %v3405_v25 = vsel %vm439_vm2, %v3361_v62, %v556_v37  ;;  %v2823_v32 = vld [vmem:[#allocation10 + $0x224] ss:$8 sps:$4 sm:$0xff]   ;;  %v2820_v43 = vld [vmem:[#allocation10 + $0x334] ss:$8 sps:$4 sm:$0xff]  }
 0x172   :  { %v553_v11 = vrot.slane %v512_v0, 4  ;;  %1768 = vmatprep.subr.bf16.mxu0 %v2808_v52  ;;  %v551_v14 = vsel %vm439_vm2, %v549_v2, %v550_v20  ;;  %v578_v15 = vsel %vm439_vm2, %v550_v20, %v577_v60  ;;  %1718 = vmatpush1.bf16.msra.mxu1 %v2809_v13  ;;  %v620_v62 = vpack.c.bf16 %v430_v18, %v426_v40  ;;  %v393_v51 = vld [vmem:[#allocation2 + $0x28] sm:$0xf]  ;;  %v2826_v55 = vld [vmem:[#allocation10 + $0x324] ss:$8 sps:$4 sm:$0xff]  }
 0x173   :  { %1647 = vmatprep.mubr.bf16.mxu1 %v624_v5  ;;  %1719 = vmatprep.subr.bf16.mxu1 %v2817_v4  ;;  %v625_v36 = vpack.c.bf16 %v578_v15, %v551_v14  ;;  %v3416_v46 = vsel %vm439_vm2, %v556_v37, %v3365_v3  ;;  %v524_v63 = vrot.slane %v3349_v49, 3  ;;  %v529_v8 = vrot.slane %v493_v35, 3  ;;  %v495_v53 = vld [vmem:[#allocation2 + $0x8] sm:$0xff] }
 0x174   :  { %v554_v21 = vsel %vm439_vm2, %v552_v9, %v553_v11  ;;  %v580_v23 = vsel %vm439_vm2, %v553_v11, %v579_v1  ;;  %1648 = vmatmul.mubr.bf16.gmra.mxu1 %v623_v12  ;;  %v627_v57 = vpack.c.bf16 %v3416_v46, %v3405_v25  ;;  %v441_v48 = vrot.slane %v3334_v22, 4  ;;  %v2818_v3 = vld [vmem:[#allocation10 + $0x330] ss:$8 sps:$4 sm:$0xff]   ;;  %v2835_v1 = vld [vmem:[#allocation10 + $0x204] ss:$8 sps:$4 sm:$0xff]  }
 0x175   :  { %v626_v29 = vpack.c.bf16 %v580_v23, %v554_v21  ;;  %1769 = vmatpush1.bf16.msra.mxu0 %v2806_v6  ;;  %1743 = vmatprep.mubr.bf16.mxu1 %v618_v45  ;;  %v2829_v45 = vld [vmem:[#allocation10 + $0x214] ss:$8 sps:$4 sm:$0xff]   ;;  %v440_v52 = vrot.slane %v391_v41, 4  ;;  %v525_v37 = vsel %vm420_vm4, %v523_v47, %v524_v63  ;;  %v530_v54 = vsel %vm420_vm4, %v524_v63, %v529_v8  ;;  %v2827_v20 = vld [vmem:[#allocation10 + $0x210] ss:$8 sps:$4 sm:$0xff]  }
 0x176   :  { %1770 = vmatprep.subr.bf16.mxu0 %v2814_v17  ;;  %1720 = vmatpush1.bf16.msra.mxu1 %v2815_v24  ;;  %v561_v56 = vrot.slane %v525_v37, 4  ;;  %v562_v59 = vrot.slane %v530_v54, 4  ;;  %v585_v49 = vrot.slane %v529_v8, 4  ;;  %v446_v60 = vrot.slane %v393_v51, 4  ;;  %v2824_v6 = vld [vmem:[#allocation10 + $0x320] ss:$8 sps:$4 sm:$0xff]  }
 0x177   :  { %1700 = vmatprep.mubr.bf16.mxu0 %v626_v29  ;;  %1721 = vmatprep.subr.bf16.mxu1 %v2823_v32  ;;  %v3425_v13 = vsel %vm439_vm2, %v440_v52, %v441_v48  ;;  %v539_v61 = vrot.slane %v496_v50, 4  ;;  %v537_v0 = vrot.slane %v495_v53, 4  ;;  %v570_v5 = vrot.slane %v3374_v33, 4  ;;  %v2832_v14 = vld [vmem:[#allocation10 + $0x314] ss:$8 sps:$4 sm:$0xff]  }
 0x178   :  { %1701 = vmatmul.mubr.bf16.gmra.mxu0 %v625_v36  ;;  %v3428_v2 = vsel %vm439_vm2, %v561_v56, %v562_v59  ;;  %v3431_v4 = vsel %vm439_vm2, %v562_v59, %v585_v49  ;;  %v3437_v9 = vsel %vm439_vm2, %v441_v48, %v446_v60  ;;  %v2833_v23 = vld [vmem:[#allocation10 + $0x200] ss:$8 sps:$4 sm:$0xff]   ;;  %v567_v24 = vrot.slane %v3378_v38, 4  ;;  %v2841_v32 = vld [vmem:[#allocation10 + $0x2f4] ss:$8 sps:$4 sm:$0xff]  }
 0x179   :  { %1796 = vmatprep.mubr.bf16.mxu0 %v620_v62  ;;  %1771 = vmatpush1.bf16.msra.mxu0 %v2812_v39  ;;  %v629_v7 = vpack.c.bf16 %v3431_v4, %v3428_v2  ;;  %v540_v11 = vsel %vm439_vm2, %v3374_v33, %v539_v61  ;;  %v591_v12 = vrot.slane %v539_v61, 4  ;;  %v621_v15 = vpack.c.bf16 %v3437_v9, %v3425_v13  ;;  %v2830_v35 = vld [vmem:[#allocation10 + $0x310] ss:$8 sps:$4 sm:$0xff]   ;;  %v2845_v47 = vld [vmem:[#allocation10 + $0x2e0] ss:$8 sps:$4 sm:$0xff]  }
 0x17a   :  { %1772 = vmatprep.subr.bf16.mxu0 %v2820_v43  ;;  %1722 = vmatpush1.bf16.msra.mxu1 %v2821_v44  ;;  %v571_v17 = vrot.slane %v540_v11, 4  ;;  %v538_v18 = vsel %vm439_vm2, %v3378_v38, %v537_v0  ;;  %v589_v21 = vrot.slane %v537_v0, 4  ;;  %v2838_v38 = vld [vmem:[#allocation10 + $0x304] ss:$8 sps:$4 sm:$0xff]   ;;  %v2839_v62 = vld [vmem:[#allocation10 + $0x2f0] ss:$8 sps:$4 sm:$0xff]  }
 0x17b   :  { %1723 = vmatprep.subr.bf16.mxu1 %v2829_v45  ;;  %v568_v29 = vrot.slane %v538_v18, 4  ;;  %v2847_v43 = vld [vmem:[#allocation10 + $0x2e4] ss:$8 sps:$4 sm:$0xff]   ;;  %v2836_v44 = vld [vmem:[#allocation10 + $0x300] ss:$8 sps:$4 sm:$0xff]   ;;  %v514_v60 = vrot.slane %v3339_v31, 4 }
 0x17c   :  { %v3447_v33 = vsel %vm439_vm2, %v570_v5, %v571_v17  ;;  %v3450_v34 = vsel %vm439_vm2, %v571_v17, %v591_v12  ;;  %v2844_v45 = vld [vmem:[#allocation10 + $0x3f4] ss:$8 sps:$4 sm:$0xff]   ;;  %v2842_v8 = vld [vmem:[#allocation10 + $0x3f0] ss:$8 sps:$4 sm:$0xff]   ;;  %v2850_v48 = vld [vmem:[#allocation10 + $0x3e4] ss:$8 sps:$4 sm:$0xff]  }
 0x17d   :  { %1773 = vmatpush1.bf16.msra.mxu0 %v2818_v3  ;;  %v632_v36 = vpack.c.bf16 %v3450_v34, %v3447_v33  ;;  %v3455_v39 = vsel %vm439_vm2, %v567_v24, %v568_v29  ;;  %v3458_v40 = vsel %vm439_vm2, %v568_v29, %v589_v21  ;;  %v2853_v63 = vld [vmem:[#allocation10 + $0x2d4] ss:$8 sps:$4 sm:$0xff]   ;;  %v2851_v51 = vld [vmem:[#allocation10 + $0x2d0] ss:$8 sps:$4 sm:$0xff]   ;;  %v2859_v52 = vld [vmem:[#allocation10 + $0x2c4] ss:$8 sps:$4 sm:$0xff]  }
 0x17e   :  { %1774 = vmatprep.subr.bf16.mxu0 %v2826_v55  ;;  %1724 = vmatpush1.bf16.msra.mxu1 %v2827_v20  ;;  %v631_v41 = vpack.c.bf16 %v3458_v40, %v3455_v39  ;;  %v2848_v50 = vld [vmem:[#allocation10 + $0x3e0] ss:$8 sps:$4 sm:$0xff]   ;;  %v2856_v53 = vld [vmem:[#allocation10 + $0x3d4] ss:$8 sps:$4 sm:$0xff]   ;;  %v2854_v54 = vld [vmem:[#allocation10 + $0x3d0] ss:$8 sps:$4 sm:$0xff]  }
 0x17f   :  { %1725 = vmatprep.subr.bf16.mxu1 %v2835_v1  ;;  %v2857_v3 = vld [vmem:[#allocation10 + $0x2c0] ss:$8 sps:$4 sm:$0xff]   ;;  %v2865_v37 = vld [vmem:[#allocation10 + $0x2b4] ss:$8 sps:$4 sm:$0xff]   ;;  %v2862_v55 = vld [vmem:[#allocation10 + $0x3c4] ss:$8 sps:$4 sm:$0xff]  }
 0x180   :  { %v2863_v56 = vld [vmem:[#allocation10 + $0x2b0] ss:$8 sps:$4 sm:$0xff]   ;;  %v2871_v59 = vld [vmem:[#allocation10 + $0x2a4] ss:$8 sps:$4 sm:$0xff]   ;;  %v2860_v49 = vld [vmem:[#allocation10 + $0x3c0] ss:$8 sps:$4 sm:$0xff]  }
 0x181   :  { %1775 = vmatpush1.bf16.msra.mxu0 %v2824_v6  ;;  %v2868_v20 = vld [vmem:[#allocation10 + $0x3b4] ss:$8 sps:$4 sm:$0xff]   ;;  %v517_v61 = vrot.slane %v3343_v42, 4  ;;  %v2869_v0 = vld [vmem:[#allocation10 + $0x2a0] ss:$8 sps:$4 sm:$0xff]   ;;  %v558_v42 = vrot.slane %v514_v60, 4 }
 0x182   :  { %1776 = vmatprep.subr.bf16.mxu0 %v2832_v14  ;;  %1726 = vmatpush1.bf16.msra.mxu1 %v2833_v23  ;;  %v2877_v1 = vld [vmem:[#allocation10 + $0x294] ss:$8 sps:$4 sm:$0xff]   ;;  %v2866_v5 = vld [vmem:[#allocation10 + $0x3b0] ss:$8 sps:$4 sm:$0xff]   ;;  %v2874_v6 = vld [vmem:[#allocation10 + $0x3a4] ss:$8 sps:$4 sm:$0xff]  }
 0x183   :  { %1727 = vmatprep.subr.bf16.mxu1 %v2841_v32  ;;  %v494_v11 = vld [vmem:[#allocation2 + $0x10] sm:$0x7f]  ;;  %v518_v12 = vsel %vm439_vm2, %v514_v60, %v517_v61  ;;  %v2875_v14 = vld [vmem:[#allocation10 + $0x290] ss:$8 sps:$4 sm:$0xff]   ;;  %v492_v18 = vld [vmem:[#allocation2 + $0x20] sm:$0x80] }
 0x184   :  { %v2883_v17 = vld [vmem:[#allocation10 + $0x284] ss:$8 sps:$4 sm:$0xff]   ;;  %v2872_v31 = vld [vmem:[#allocation10 + $0x3a0] ss:$8 sps:$4 sm:$0xff]   ;;  %v531_v21 = vrot.slane %v494_v11, 3  ;;  %v559_v23 = vrot.slane %v518_v12, 4 }
 0x185   :  { %1777 = vmatpush1.bf16.msra.mxu0 %v2830_v35  ;;  %v583_v24 = vrot.slane %v517_v61, 4  ;;  %v2880_v29 = vld [vmem:[#allocation10 + $0x394] ss:$8 sps:$4 sm:$0xff]   ;;  %v2881_v32 = vld [vmem:[#allocation10 + $0x280] ss:$8 sps:$4 sm:$0xff]   ;;  %v526_v35 = vrot.slane %v492_v18, 3 }
 0x186   :  { %1778 = vmatprep.subr.bf16.mxu0 %v2838_v38  ;;  %1728 = vmatpush2.bf16.msra.mxu1 %v2839_v62  ;;  %v527_v38 = vrot.slane %v3358_v58, 3  ;;  %v2889_v62 = vld [vmem:[#allocation10 + $0x474] ss:$8 sps:$4 sm:$0xff]   ;;  %v394_v58 = vld [vmem:[#allocation2 + $0x20] sm:$0xf] }
 0x187   :  { %1729 = vmatprep.subr.bf16.mxu1 %v2847_v43  ;;  %v389_v43 = vld [vmem:[#allocation2 + $0x28] sm:$0x7]  ;;  %v448_v60 = vrot.slane %v394_v58, 4  ;;  %v2910_v46 = vld [vmem:[#allocation10 + $0x404] ss:$8 sps:$4 sm:$0xff]  }
 0x188   :  { %v2905_v25 = vld [vmem:[#allocation10 + $0x410] ss:$8 sps:$4 sm:$0xff]   ;;  %v2914_v2 = vld [vmem:[#allocation10 + $0x4e0] ss:$8 sps:$4 sm:$0xff]   ;;  %v2919_v4 = vld [vmem:[#allocation10 + $0x4d4] ss:$8 sps:$4 sm:$0xff]  }
 0x189   :  { %1779 = vmatpush1.bf16.msra.mxu0 %v2836_v44  ;;  %v2878_v44 = vld [vmem:[#allocation10 + $0x390] ss:$8 sps:$4 sm:$0xff]  }
 0x18a   :  { %1780 = vmatprep.subr.bf16.mxu0 %v2844_v45  ;;  %1730 = vmatpush2.bf16.msra.mxu1 %v2845_v47  ;;  %v532_v45 = vsel %vm420_vm4, %v527_v38, %v531_v21  ;;  %v2886_v47 = vld [vmem:[#allocation10 + $0x384] ss:$8 sps:$4 sm:$0xff]  }
 0x18b   :  { %1731 = vmatprep.subr.bf16.mxu1 %v2853_v63  ;;  %v560_v63 = vsel %vm439_vm2, %v558_v42, %v559_v23  ;;  %v2899_v42 = vld [vmem:[#allocation10 + $0x430] ss:$8 sps:$4 sm:$0xff]  }
 0x18d   :  { %1781 = vmatpush2.bf16.msra.mxu0 %v2842_v8  ;;  %v584_v8 = vsel %vm439_vm2, %v559_v23, %v583_v24  ;;  %v2904_v23 = vld [vmem:[#allocation10 + $0x424] ss:$8 sps:$4 sm:$0xff]   ;;  %v2902_v24 = vld [vmem:[#allocation10 + $0x420] ss:$8 sps:$4 sm:$0xff]  }
 0x18e   :  { %1782 = vmatprep.subr.bf16.mxu0 %v2850_v48  ;;  %1732 = vmatpush2.bf16.msra.mxu1 %v2851_v51  ;;  %v387_v48 = vld [vmem:[#allocation2 + $0x40] sm:$0xf8] }
 0x18f   :  { %1733 = vmatprep.subr.bf16.mxu1 %v2859_v52  ;;  %v2887_v51 = vld [vmem:[#allocation10 + $0x470] ss:$8 sps:$4 sm:$0xff]   ;;  %v427_v52 = vrot.slane %v389_v43, 3  ;;  %v2920_v43 = vld [vmem:[#allocation10 + $0x4c0] ss:$8 sps:$4 sm:$0xff]  }
 0x191   :  { %1783 = vmatpush2.bf16.msra.mxu0 %v2848_v50  ;;  %v528_v50 = vsel %vm420_vm4, %v526_v35, %v527_v38  ;;  %v2911_v35 = vld [vmem:[#allocation10 + $0x4f0] ss:$8 sps:$4 sm:$0xff]   ;;  %v2916_v38 = vld [vmem:[#allocation10 + $0x4e4] ss:$8 sps:$4 sm:$0xff]  }
 0x192   :  { %1784 = vmatprep.subr.bf16.mxu0 %v2856_v53  ;;  %1734 = vmatpush2.bf16.msra.mxu1 %v2857_v3  ;;  %v565_v53 = vrot.slane %v532_v45, 4  ;;  %v587_v3 = vrot.slane %v531_v21, 4  ;;  %v2901_v21 = vld [vmem:[#allocation10 + $0x434] ss:$8 sps:$4 sm:$0xff]   ;;  %v2923_v45 = vld [vmem:[#allocation10 + $0x4b0] ss:$8 sps:$4 sm:$0xff]  }
 0x193   :  { %1735 = vmatprep.subr.bf16.mxu1 %v2865_v37  ;;  %v2892_v37 = vld [vmem:[#allocation10 + $0x464] ss:$8 sps:$4 sm:$0xff]  }
 0x195   :  { %1785 = vmatpush2.bf16.msra.mxu0 %v2854_v54  ;;  %v422_v54 = vrot.slane %v3334_v22, 3 }
 0x196   :  { %1786 = vmatprep.subr.bf16.mxu0 %v2862_v55  ;;  %1736 = vmatpush2.bf16.msra.mxu1 %v2863_v56  ;;  %v2884_v55 = vld [vmem:[#allocation10 + $0x380] ss:$8 sps:$4 sm:$0xff]   ;;  %v628_v56 = vpack.c.bf16 %v584_v8, %v560_v63  ;;  %v2931_v8 = vld [vmem:[#allocation10 + $0x494] ss:$8 sps:$4 sm:$0xff]  }
 0x197   :  { %1737 = vmatprep.subr.bf16.mxu1 %v2871_v59  ;;  %v421_v59 = vrot.slane %v387_v48, 3  ;;  %v428_v61 = vsel %vm420_vm4, %v422_v54, %v427_v52  ;;  %v2926_v63 = vld [vmem:[#allocation10 + $0x4a0] ss:$8 sps:$4 sm:$0xff]   ;;  %v2929_v48 = vld [vmem:[#allocation10 + $0x490] ss:$8 sps:$4 sm:$0xff]  }
 0x198   :  { %v2932_v52 = vld [vmem:[#allocation10 + $0x480] ss:$8 sps:$4 sm:$0xff]  }
 0x199   :  { %1787 = vmatpush2.bf16.msra.mxu0 %v2860_v49  ;;  %v392_v49 = vld [vmem:[#allocation2] sm:$0xf0]  ;;  %v423_v10 = vsel %vm420_vm4, %v421_v59, %v422_v54 }
 0x19a   :  { %1788 = vmatprep.subr.bf16.mxu0 %v2868_v20  ;;  %1738 = vmatpush2.bf16.msra.mxu1 %v2869_v0  ;;  %v564_v20 = vrot.slane %v528_v50, 4  ;;  %v2890_v0 = vld [vmem:[#allocation10 + $0x460] ss:$8 sps:$4 sm:$0xff]   ;;  %v443_v11 = vrot.slane %v392_v49, 4  ;;  %v619_v16 = vpack.c.bf16 %v428_v61, %v423_v10 }
 0x19b   :  { %1739 = vmatprep.subr.bf16.mxu1 %v2877_v1  ;;  %v444_v1 = vrot.slane %v3337_v26, 4  ;;  %v793_v61 = vld [vmem:[#allocation12] sm:$0x3] }
 0x19c   :  { %v566_v22 = vsel %vm439_vm2, %v564_v20, %v565_v53 }
 0x19d   :  { %1789 = vmatpush2.bf16.msra.mxu0 %v2866_v5  ;;  %v588_v5 = vsel %vm439_vm2, %v565_v53, %v587_v3  ;;  %v445_v26 = vsel %vm439_vm2, %v443_v11, %v444_v1  ;;  %v802_v11 = vrot.slane %v793_v61, %v3314_v30 }
 0x19e   :  { %1790 = vmatprep.subr.bf16.mxu0 %v2874_v6  ;;  %1740 = vmatpush2.bf16.msra.mxu1 %v2875_v14  ;;  %v2895_v6 = vld [vmem:[#allocation10 + $0x454] ss:$8 sps:$4 sm:$0xff]   ;;  %v630_v12 = vpack.c.bf16 %v588_v5, %v566_v22  ;;  %v2893_v14 = vld [vmem:[#allocation10 + $0x450] ss:$8 sps:$4 sm:$0xff]   ;;  %v798_v22 = vrot.slane %v793_v61, %v3311_v28 }
 0x19f   :  { %1741 = vmatprep.subr.bf16.mxu1 %v2883_v17  ;;  %v2898_v17 = vld [vmem:[#allocation10 + $0x444] ss:$8 sps:$4 sm:$0xff]  }
 0x1a1   :  { %1791 = vmatpush2.bf16.msra.mxu0 %v2872_v31  ;;  %v2896_v31 = vld [vmem:[#allocation10 + $0x440] ss:$8 sps:$4 sm:$0xff]  }
 0x1a2   :  { %1792 = vmatprep.subr.bf16.mxu0 %v2880_v29  ;;  %1742 = vmatpush2.bf16.msra.mxu1 %v2881_v32  ;;  %v2907_v29 = vld [vmem:[#allocation10 + $0x414] ss:$8 sps:$4 sm:$0xff]  }
 0x1a3   :  { %1817 = vmatprep.subr.bf16.mxu1 %v2889_v62  ;;  %v2913_v32 = vld [vmem:[#allocation10 + $0x4f4] ss:$8 sps:$4 sm:$0xff]   ;;  %v2922_v62 = vld [vmem:[#allocation10 + $0x4c4] ss:$8 sps:$4 sm:$0xff]  }
 0x1a5   :  { %1793 = vmatpush2.bf16.msra.mxu0 %v2878_v44  ;;  %1744 = vmatmul.mubr.bf16.vlgmr.msra.gmra.mxu1 %v617_v19  ;;  %v449_v19 = vsel %vm439_vm2, %v444_v1, %v448_v60  ;;  %v2925_v44 = vld [vmem:[#allocation10 + $0x4b4] ss:$8 sps:$4 sm:$0xff]  }
 0x1a6   :  { %1794 = vmatprep.subr.bf16.mxu0 %v2886_v47  ;;  %1753 = vmatprep.mubr.bf16.mxu1 %v628_v56  ;;  %v622_v18 = vpack.c.bf16 %v449_v19, %v445_v26  ;;  %v2928_v47 = vld [vmem:[#allocation10 + $0x4a4] ss:$8 sps:$4 sm:$0xff]  }
 0x1a7   :  { %1818 = vmatpush1.bf16.msra.mxu1 %v2887_v51  ;;  %v2934_v51 = vld [vmem:[#allocation10 + $0x484] ss:$8 sps:$4 sm:$0xff]  }
 0x1a8   :  { %1819 = vmatprep.subr.bf16.mxu1 %v2892_v37 }
 0x1a9   :  { %1795 = vmatpush2.bf16.msra.mxu0 %v2884_v55 }
 0x1ab   :  { %1820 = vmatpush1.bf16.msra.mxu1 %v2890_v0 }
 0x1ac   :  { %1797 = vmatmul.mubr.bf16.vlgmr.msra.gmra.mxu0 %v619_v16  ;;  %1821 = vmatprep.subr.bf16.mxu1 %v2895_v6 }
 0x1ad   :  { %1806 = vmatprep.mubr.bf16.mxu0 %v630_v12  ;;  %1754 = vmatmul.mubr.bf16.gmra.mxu1 %v627_v57  ;;  %v2908_v57 = vld [vmem:[#allocation10 + $0x400] ss:$8 sps:$4 sm:$0xff]  }
 0x1ae   :  { %1849 = vmatprep.mubr.bf16.mxu1 %v622_v18 }
 0x1af   :  { %1822 = vmatpush1.bf16.msra.mxu1 %v2893_v14 }
 0x1b0   :  { %1823 = vmatprep.subr.bf16.mxu1 %v2898_v17 }
 0x1b3   :  { %1824 = vmatpush1.bf16.msra.mxu1 %v2896_v31 }
 0x1b4   :  { %1807 = vmatmul.mubr.bf16.gmra.mxu0 %v629_v7  ;;  %1825 = vmatprep.subr.bf16.mxu1 %v2901_v21  ;;  %v2917_v7 = vld [vmem:[#allocation10 + $0x4d0] ss:$8 sps:$4 sm:$0xff]  }
 0x1b7   :  { %1826 = vmatpush1.bf16.msra.mxu1 %v2899_v42 }
 0x1b8   :  { %1827 = vmatprep.subr.bf16.mxu1 %v2904_v23 }
 0x1bb   :  { %1828 = vmatpush1.bf16.msra.mxu1 %v2902_v24 }
 0x1bc   :  { %1829 = vmatprep.subr.bf16.mxu1 %v2907_v29 }
 0x1bf   :  { %1830 = vmatpush1.bf16.msra.mxu1 %v2905_v25 }
 0x1c0   :  { %1831 = vmatprep.subr.bf16.mxu1 %v2910_v46 }
 0x1c3   :  { %1832 = vmatpush1.bf16.msra.mxu1 %v2908_v57 }
 0x1c4   :  { %1833 = vmatprep.subr.bf16.mxu1 %v2913_v32 }
 0x1c7   :  { %1834 = vmatpush2.bf16.msra.mxu1 %v2911_v35 }
 0x1c8   :  { %1835 = vmatprep.subr.bf16.mxu1 %v2916_v38 }
 0x1cb   :  { %1836 = vmatpush2.bf16.msra.mxu1 %v2914_v2 }
 0x1cc   :  { %1837 = vmatprep.subr.bf16.mxu1 %v2919_v4 }
 0x1cf   :  { %1838 = vmatpush2.bf16.msra.mxu1 %v2917_v7 }
 0x1d0   :  { %1839 = vmatprep.subr.bf16.mxu1 %v2922_v62 }
 0x1d3   :  { %1840 = vmatpush2.bf16.msra.mxu1 %v2920_v43 }
 0x1d4   :  { %1841 = vmatprep.subr.bf16.mxu1 %v2925_v44 }
 0x1d7   :  { %1842 = vmatpush2.bf16.msra.mxu1 %v2923_v45 }
 0x1d8   :  { %1843 = vmatprep.subr.bf16.mxu1 %v2928_v47 }
 0x1db   :  { %1844 = vmatpush2.bf16.msra.mxu1 %v2926_v63 }
 0x1dc   :  { %1845 = vmatprep.subr.bf16.mxu1 %v2931_v8 }
 0x1df   :  { %1846 = vmatpush2.bf16.msra.mxu1 %v2929_v48 }
 0x1e0   :  { %1847 = vmatprep.subr.bf16.mxu1 %v2934_v51 }
 0x1e3   :  { %1848 = vmatpush2.bf16.msra.mxu1 %v2932_v52 }
 0x1e6   :  { %1850 = vmatmul.mubr.bf16.vlgmr.msra.gmra.mxu1 %v621_v15 }
 0x1e7   :  { %1859 = vmatprep.mubr.bf16.mxu1 %v632_v36 }
 0x1ee   :  { %1860 = vmatmul.mubr.bf16.gmra.mxu1 %v631_v41 }
 0x225   :  { %v1639_v50 = vpop.f32.mrf.mxu1 }
 0x226   :  { %v1640_v10 = vadd.f32 %v1639_v50, %v798_v22 }
 0x227   :  { %v1641_v58 = vpop.f32.mrf.mxu1 }
 0x228   :  { %v1642_v12 = vadd.f32 %v1641_v58, %v802_v11 }
 0x229   :  { %v1643_v53 = vpop.f32.mrf.mxu1 }
 0x22a   :  { %v1644_v26 = vadd.f32 %v1643_v53, %v798_v22 }
 0x22b   :  { %v1645_v37 = vpop.f32.mrf.mxu1 }
 0x22c   :  { %v1692_v3 = vpop.f32.mrf.mxu0  ;;  %v1646_v23 = vadd.f32 %v1645_v37, %v802_v11 }
 0x22d   :  { %v1693_v14 = vadd.f32 %v1692_v3, %v1640_v10 }
 0x22e   :  { %v1694_v55 = vpop.f32.mrf.mxu0 }
 0x22f   :  { %v1695_v17 = vadd.f32 %v1694_v55, %v1642_v12 }
 0x230   :  { %v1696_v59 = vpop.f32.mrf.mxu0 }
 0x231   :  { %v1697_v24 = vadd.f32 %v1696_v59, %v1644_v26 }
 0x232   :  { %v1698_v13 = vpop.f32.mrf.mxu0 }
 0x233   :  { %v1699_v32 = vadd.f32 %v1698_v13, %v1646_v23 }
 0x234   :  { %v1649_v54 = vpop.f32.mrf.mxu1 }
 0x235   :  { %v1650_v31 = vadd.f32 %v1649_v54, %v798_v22 }
 0x236   :  { %v1651_v56 = vpop.f32.mrf.mxu1 }
 0x237   :  { %v1652_v46 = vadd.f32 %v1651_v56, %v802_v11 }
 0x238   :  { %v1653_v49 = vpop.f32.mrf.mxu1  ;;  %v1702_v9 = vpop.f32.mrf.mxu0 }
 0x239   :  { %v1703_v4 = vadd.f32 %v1702_v9, %v1650_v31  ;;  %v1654_v7 = vadd.f32 %v1653_v49, %v798_v22 }
 0x23a   :  { %v1655_v15 = vpop.f32.mrf.mxu1  ;;  %v1704_v33 = vpop.f32.mrf.mxu0 }
 0x23b   :  { %v1705_v8 = vadd.f32 %v1704_v33, %v1652_v46  ;;  %v1656_v48 = vadd.f32 %v1655_v15, %v802_v11 }
 0x23c   :  { %v1706_v36 = vpop.f32.mrf.mxu0 }
 0x23d   :  { %v1707_v3 = vadd.f32 %v1706_v36, %v1654_v7 }
 0x23e   :  { %v1708_v39 = vpop.f32.mrf.mxu0 }
 0x23f   :  { %v1709_v13 = vadd.f32 %v1708_v39, %v1656_v48 }
 0x265   :  { %v1745_v20 = vpop.f32.mrf.mxu1 }
 0x266   :  { %v1746_v18 = vadd.f32 %v1745_v20, %v1693_v14 }
 0x267   :  { %v1747_v34 = vpop.f32.mrf.mxu1 }
 0x268   :  { %v1748_v29 = vadd.f32 %v1747_v34, %v1695_v17 }
 0x269   :  { %v1749_v60 = vpop.f32.mrf.mxu1 }
 0x26a   :  { %v1750_v35 = vadd.f32 %v1749_v60, %v1697_v24 }
 0x26b   :  { %v1751_v41 = vpop.f32.mrf.mxu1 }
 0x26c   :  { %v1798_v40 = vpop.f32.mrf.mxu0  ;;  %v1752_v44 = vadd.f32 %v1751_v41, %v1699_v32 }
 0x26d   :  { %v1755_v1 = vpop.f32.mrf.mxu1  ;;  %v1799_v25 = vadd.f32 %v1798_v40, %v1746_v18 }
 0x26e   :  { %v1800_v0 = vpop.f32.mrf.mxu0  ;;  %v1756_v51 = vadd.f32 %v1755_v1, %v1703_v4 }
 0x26f   :  { %v1757_v6 = vpop.f32.mrf.mxu1  ;;  %v1801_v38 = vadd.f32 %v1800_v0, %v1748_v29 }
 0x270   :  { %v1802_v5 = vpop.f32.mrf.mxu0  ;;  %v1758_v37 = vadd.f32 %v1757_v6, %v1705_v8 }
 0x271   :  { %v1759_v19 = vpop.f32.mrf.mxu1  ;;  %v1803_v45 = vadd.f32 %v1802_v5, %v1750_v35 }
 0x272   :  { %v1804_v16 = vpop.f32.mrf.mxu0  ;;  %v1760_v9 = vadd.f32 %v1759_v19, %v1707_v3 }
 0x273   :  { %v1761_v42 = vpop.f32.mrf.mxu1  ;;  %v1805_v50 = vadd.f32 %v1804_v16, %v1752_v44 }
 0x274   :  { %v1808_v21 = vpop.f32.mrf.mxu0  ;;  %v1762_v60 = vadd.f32 %v1761_v42, %v1709_v13  ;;  %v1926_v13 = vld [vmem:[%s3592_s5] sm:$0xf]  ;;  %s1965_s5 = sld [smem:[#allocation13]] }
 0x275   :  { %v1809_v56 = vadd.f32 %v1808_v21, %v1756_v51 }
 0x276   :  { %v1810_v62 = vpop.f32.mrf.mxu0 }
 0x277   :  { %v1811_v20 = vadd.f32 %v1810_v62, %v1758_v37 }
 0x278   :  { %v1812_v54 = vpop.f32.mrf.mxu0 }
 0x279   :  { %v1813_v61 = vadd.f32 %v1812_v54, %v1760_v9 }
 0x27a   :  { %v1814_v40 = vpop.f32.mrf.mxu0 }
 0x27b   :  { %v1815_v22 = vadd.f32 %v1814_v40, %v1762_v60 }
 0x2a6   :  { %v1851_v57 = vpop.f32.mrf.mxu1 }
 0x2a7   :  { %v3498_v2 = vadd.f32 %v1851_v57, %v1799_v25 }
 0x2a8   :  { %v1853_v43 = vpop.f32.mrf.mxu1 }
 0x2a9   :  { %v2596_v47 = vmul.f32 -1.442695, %v3498_v2  ;;  %v3501_v63 = vadd.f32 %v1853_v43, %v1801_v38 }
 0x2aa   :  { %v1855_v52 = vpop.f32.mrf.mxu1 }
 0x2ab   :  { %2983 = vpow2.f32 %v2596_v47  ;;  %v2597_v58 = vmul.f32 -1.442695, %v3501_v63  ;;  %v3504_v53 = vadd.f32 %v1855_v52, %v1803_v45 }
 0x2ac   :  { %v1857_v55 = vpop.f32.mrf.mxu1 }
 0x2ad   :  { %2985 = vpow2.f32 %v2597_v58  ;;  %v2598_v59 = vmul.f32 -1.442695, %v3504_v53  ;;  %v1858_v49 = vadd.f32 %v1857_v55, %v1805_v50 }
 0x2ae   :  { %v1861_v15 = vpop.f32.mrf.mxu1 }
 0x2af   :  { %2987 = vpow2.f32 %v2598_v59  ;;  %v2599_v33 = vmul.f32 -1.442695, %v1858_v49  ;;  %v1862_v34 = vadd.f32 %v1861_v15, %v1809_v56  ;;  %v1953_v15 = vsub.s32 2, %v3308_v27 }
 0x2b0   :  { %v1863_v41 = vpop.f32.mrf.mxu1 }
 0x2b1   :  { %2989 = vpow2.f32 %v2599_v33  ;;  %v2600_v36 = vmul.f32 -1.442695, %v1862_v34  ;;  %v1864_v0 = vadd.f32 %v1863_v41, %v1811_v20  ;;  %v2013_v20 = vsub.s32 3, %v3308_v27 }
 0x2b2   :  { %v1865_v1 = vpop.f32.mrf.mxu1  ;;  %v1950_v41 = vrot.slane %v1926_v13, %v3311_v28 }
 0x2b3   :  { %2991 = vpow2.f32 %v2600_v36  ;;  %v2601_v5 = vmul.f32 -1.442695, %v1864_v0  ;;  %v1866_v6 = vadd.f32 %v1865_v1, %v1813_v61 }
 0x2b4   :  { %v1867_v11 = vpop.f32.mrf.mxu1 }
 0x2b5   :  { %2993 = vpow2.f32 %v2601_v5  ;;  %v2602_v39 = vmul.f32 -1.442695, %v1866_v6  ;;  %v1868_v10 = vadd.f32 %v1867_v11, %v1815_v22  ;;  %v1954_v22 = vrot.slane %v1926_v13, %v1953_v15 }
 0x2b6   :  { %v2014_v5 = vrot.slane %v1926_v13, %v2013_v20 }
 0x2b7   :  { %2995 = vpow2.f32 %v2602_v39  ;;  %v2603_v16 = vmul.f32 -1.442695, %v1868_v10 }
 0x2b8   :  { %v2984_v19 = vpop.eup %2983 }
 0x2b9   :  { %v1894_v12 = vadd.f32 1.0, %v2984_v19  ;;  %2997 = vpow2.f32 %v2603_v16 }
 0x2ba   :  { %v2986_v14 = vpop.eup %2985 }
 0x2bb   :  { %v1895_v26 = vadd.f32 1.0, %v2986_v14  ;;  %2999 = vrcp.f32 %v1894_v12  ;;  %v2010_v14 = vrot.slane %v1926_v13, %v3314_v30  ;;  %v2938_v13 = vld [vmem:[#allocation14 + $0x30] sm:$0xff]  }
 0x2bc   :  { %v2988_v17 = vpop.eup %2987 }
 0x2bd   :  { %v1896_v18 = vadd.f32 1.0, %v2988_v17  ;;  %3001 = vrcp.f32 %v1895_v26 }
 0x2be   :  { %v2990_v31 = vpop.eup %2989 }
 0x2bf   :  { %3003 = vrcp.f32 %v1896_v18  ;;  %v1897_v21 = vadd.f32 1.0, %v2990_v31 }
 0x2c0   :  { %v2992_v42 = vpop.eup %2991 }
 0x2c1   :  { %3005 = vrcp.f32 %v1897_v21  ;;  %v1898_v23 = vadd.f32 1.0, %v2992_v42 }
 0x2c2   :  { %v2994_v24 = vpop.eup %2993 }
 0x2c3   :  { %v1899_v29 = vadd.f32 1.0, %v2994_v24  ;;  %3007 = vrcp.f32 %v1898_v23 }
 0x2c4   :  { %v2996_v25 = vpop.eup %2995 }
 0x2c5   :  { %v1900_v46 = vadd.f32 1.0, %v2996_v25  ;;  %3009 = vrcp.f32 %v1899_v29 }
 0x2c6   :  { %v2998_v57 = vpop.eup %2997 }
 0x2c7   :  { %3011 = vrcp.f32 %v1900_v46  ;;  %v1901_v32 = vadd.f32 1.0, %v2998_v57 }
 0x2c8   :  { %v3000_v35 = vpop.eup %2999 }
 0x2c9   :  { %3013 = vrcp.f32 %v1901_v32  ;;  %v3508_v7 = vmul.f32 %v3000_v35, %v3498_v2 }
 0x2ca   :  { %v3002_v38 = vpop.eup %3001 }
 0x2cb   :  { %v3514_v44 = vmul.f32 %v3002_v38, %v3501_v63 }
 0x2cc   :  { %v3004_v4 = vpop.eup %3003 }
 0x2cd   :  { %v3511_v62 = vmul.f32 %v3004_v4, %v3504_v53 }
 0x2ce   :  { %v3006_v43 = vpop.eup %3005 }
 0x2cf   :  { %v1929_v45 = vadd.f32 %v3511_v62, %v3508_v7  ;;  %v3518_v47 = vmul.f32 %v3006_v43, %v1858_v49 }
 0x2d0   :  { %v3008_v51 = vpop.eup %3007 }
 0x2d1   :  { %v1930_v8 = vrot.slane %v1929_v45, 4  ;;  %v1936_v48 = vadd.f32 %v3518_v47, %v3514_v44  ;;  %v3522_v37 = vmul.f32 %v3008_v51, %v1862_v34 }
 0x2d2   :  { %v3010_v52 = vpop.eup %3009 }
 0x2d3   :  { %v1931_v2 = vadd.f32 %v1930_v8, %v1929_v45  ;;  %v1937_v50 = vrot.slane %v1936_v48, 4  ;;  %v3526_v55 = vmul.f32 %v3010_v52, %v1864_v0 }
 0x2d4   :  { %v3012_v58 = vpop.eup %3011 }
 0x2d5   :  { %v1932_v53 = vrot.slane %v1931_v2, 2  ;;  %v1938_v3 = vadd.f32 %v1937_v50, %v1936_v48  ;;  %v3524_v63 = vmul.f32 %v3012_v58, %v1866_v6 }
 0x2d6   :  { %v3014_v54 = vpop.eup %3013 }
 0x2d7   :  { %v1939_v56 = vrot.slane %v1938_v3, 2  ;;  %v2086_v59 = vadd.f32 %v3524_v63, %v3522_v37  ;;  %v3530_v49 = vmul.f32 %v3014_v54, %v1868_v10  ;;  %v1933_v9 = vadd.f32 %v1932_v53, %v1931_v2  ;;  %v2935_v54 = vld [vmem:[#allocation14 + $0x78] sm:$0xff]  }
 0x2d8   :  { %2628 = vmatprep.subr.bf16.mxu0 %v2935_v54 }
 0x2d9   :  { %v2087_v33 = vrot.slane %v2086_v59, 4  ;;  %v2093_v34 = vadd.f32 %v3530_v49, %v3526_v55  ;;  %v1934_v60 = vrot.slane %v1933_v9, 1  ;;  %v1940_v40 = vadd.f32 %v1939_v56, %v1938_v3  ;;  %v2936_v56 = vld [vmem:[#allocation14 + $0x38] sm:$0xff]  }
 0x2da   :  { %2629 = vmatpush3.bf16.msra.mxu0 %v2936_v56 }
 0x2db   :  { %v2088_v61 = vadd.f32 %v2087_v33, %v2086_v59  ;;  %v2094_v36 = vrot.slane %v2093_v34, 4  ;;  %v1935_v0 = vadd.f32 %v1934_v60, %v1933_v9  ;;  %v1941_v1 = vrot.slane %v1940_v40, 1  ;;  %v2937_v59 = vld [vmem:[#allocation14 + $0x70] sm:$0xff]   ;;  %v2939_v9 = vld [vmem:[#allocation14 + $0x68] sm:$0xff]   ;;  %v2942_v60 = vld [vmem:[#allocation14 + $0x20] sm:$0xff]  }
 0x2dc   :  { %2630 = vmatprep.subr.bf16.mxu0 %v2937_v59  ;;  %v2940_v33 = vld [vmem:[#allocation14 + $0x28] sm:$0xff]  }
 0x2dd   :  { %v2089_v6 = vrot.slane %v2088_v61, 2  ;;  %v2095_v11 = vadd.f32 %v2094_v36, %v2093_v34  ;;  %v1942_v39 = vadd.f32 %v1941_v1, %v1940_v40  ;;  %v1944_v10 = vmul.f32 0.0625, %v1935_v0  ;;  %v2941_v34 = vld [vmem:[#allocation14 + $0x60] sm:$0xff]   ;;  %v2943_v40 = vld [vmem:[#allocation14 + $0x58] sm:$0xff]   ;;  %v2946_v36 = vld [vmem:[#allocation14 + $0x10] sm:$0xff]  }
 0x2de   :  { %2631 = vmatpush3.bf16.msra.mxu0 %v2938_v13  ;;  %v2947_v0 = vld [vmem:[#allocation14 + $0x48] sm:$0xff]  }
 0x2df   :  { %v2096_v16 = vrot.slane %v2095_v11, 2  ;;  %v1945_v19 = vmul.f32 0.0625, %v1942_v39  ;;  %v1957_v12 = vmul.f32 %v1950_v41, %v1944_v10  ;;  %v2090_v26 = vadd.f32 %v2089_v6, %v2088_v61  ;;  %2632 = vmatprep.subr.bf16.mxu0 %v2939_v9  ;;  %v2945_v61 = vld [vmem:[#allocation14 + $0x50] sm:$0xff]   ;;  %v2948_v1 = vld [vmem:[#allocation14 + $0x8] sm:$0xff]  }
 0x2e0   :  { %v2017_v24 = vmul.f32 %v2010_v14, %v1944_v10  ;;  %v1966_v6 = vstv %s1965_s5  ;;  %v2025_v10 = vstv %s2605_s9 }
 0x2e1   :  { %v1958_v17 = vmul.f32 %v1954_v22, %v1945_v19  ;;  %v2018_v18 = vmul.f32 %v2014_v5, %v1945_v19  ;;  %v2091_v31 = vrot.slane %v2090_v26, 1  ;;  %v2097_v21 = vadd.f32 %v2096_v16, %v2095_v11 }
 0x2e2   :  { %v1960_v42 = vsel %vm1959_vm5, %v1957_v12, 0.0  ;;  %v2019_v38 = vsel %vm1959_vm5, %v2017_v24, 0.0  ;;  %2633 = vmatpush3.bf16.msra.mxu0 %v2940_v33 }
 0x2e3   :  { %v1961_v23 = vsel %vm1959_vm5, %v1958_v17, 0.0  ;;  %v2092_v25 = vadd.f32 %v2091_v31, %v2090_v26  ;;  %v2098_v46 = vrot.slane %v2097_v21, 1  ;;  %v2020_v57 = vsel %vm1959_vm5, %v2018_v18, 0.0  ;;  %2634 = vmatprep.subr.bf16.mxu0 %v2941_v34 }
 0x2e4   :  { %v1962_v29 = vadd.f32 %v1961_v23, %v1960_v42  ;;  %v2021_v4 = vadd.f32 %v2020_v57, %v2019_v38  ;;  %v3216_v57 = vmov 1966171168   ;;  %v1927_v38 = vld [vmem:[%s3594_s7] sm:$0xf] }
 0x2e5   :  { %v2099_v32 = vadd.f32 %v2098_v46, %v2097_v21  ;;  %v2100_v35 = vmul.f32 0.0625, %v2092_v25 }
 0x2e6   :  { %1963 = vadd.xlane.f32.xlu0 %v1962_v29  ;;  %2635 = vmatpush3.bf16.msra.mxu0 %v2942_v60 }
 0x2e7   :  { %v2101_v43 = vmul.f32 0.0625, %v2099_v32  ;;  %v2102_v45 = vmul.f32 %v2100_v35, %v1950_v41  ;;  %v2138_v2 = vmul.f32 %v2100_v35, %v2010_v14  ;;  %v2944_v41 = vld [vmem:[#allocation14 + $0x18] sm:$0xff]   ;;  %2636 = vmatprep.subr.bf16.mxu0 %v2943_v40  ;;  %v1992_v32 = vunpack.c.l.s4 %v3216_v57  ;;  %v1928_v40 = vld [vmem:[%s3595_s8] sm:$0x3] }
 0x2e9   :  { %v2103_v8 = vmul.f32 %v2101_v43, %v1954_v22  ;;  %v2139_v48 = vmul.f32 %v2101_v43, %v2014_v5  ;;  %v2104_v51 = vsel %vm1959_vm5, %v2102_v45, 0.0  ;;  %v2140_v53 = vsel %vm1959_vm5, %v2138_v2, 0.0  ;;  %v2949_v22 = vld [vmem:[#allocation14 + $0x40] sm:$0xff]  }
 0x2ea   :  { %2022 = vadd.xlane.f32.xlu0 %v2021_v4  ;;  %2637 = vmatpush3.bf16.msra.mxu0 %v2944_v41  ;;  %v2950_v5 = vld [vmem:[#allocation14] sm:$0xff]   ;;  %v1993_v43 = vunpack.c.0.s8 %v1992_v32 }
 0x2eb   :  { %v2105_v52 = vsel %vm1959_vm5, %v2103_v8, 0.0  ;;  %v2141_v58 = vsel %vm1959_vm5, %v2139_v48, 0.0  ;;  %2638 = vmatprep.subr.bf16.mxu0 %v2945_v61  ;;  %v1979_v8 = vrot.slane %v1927_v38, %v3311_v28  ;;  %v1983_v48 = vrot.slane %v1927_v38, %v1953_v15 }
 0x2ec   :  { %v2106_v50 = vadd.f32 %v2105_v52, %v2104_v51  ;;  %v2142_v3 = vadd.f32 %v2141_v58, %v2140_v53  ;;  %v1996_v2 = vsub.s32 %v1993_v43, %v3308_v27  ;;  %v2037_v53 = vrot.slane %v1927_v38, %v3314_v30 }
 0x2ee   :  { %2107 = vadd.xlane.f32.xlu1 %v2106_v50  ;;  %2639 = vmatpush3.bf16.msra.mxu0 %v2946_v36 }
 0x2ef   :  { %2640 = vmatprep.subr.bf16.mxu0 %v2947_v0 }
 0x2f2   :  { %2143 = vadd.xlane.f32.xlu1 %v2142_v3  ;;  %2641 = vmatpush3.bf16.msra.mxu0 %v2948_v1  ;;  %v2041_v3 = vrot.slane %v1927_v38, %v2013_v20 }
 0x2f3   :  { %2642 = vmatprep.subr.bf16.mxu0 %v2949_v22 }
 0x2f6   :  { %2643 = vmatpush3.bf16.msra.mxu0 %v2950_v5 }
 0x36f   :  { %v1964_v11 = vpop.xlane.xlu0 %1963 }
 0x370   :  { %v1967_v39 = vadd.f32 %v1966_v6, %v1964_v11 }
 0x372   :  { %v2604_v16 = vmul.f32 -1.442695, %v1967_v39 }
 0x373   :  { %v2023_v19 = vpop.xlane.xlu0 %2022 }
 0x374   :  { %3015 = vpow2.f32 %v2604_v16  ;;  %v2026_v12 = vadd.f32 %v2025_v10, %v2023_v19 }
 0x376   :  { %v2606_v14 = vmul.f32 -1.442695, %v2026_v12 }
 0x377   :  { %v2108_v26 = vpop.xlane.xlu1 %2107 }
 0x378   :  { %3017 = vpow2.f32 %v2606_v14  ;;  %v2109_v17 = vadd.f32 %v2108_v26, %v1966_v6 }
 0x37a   :  { %v2608_v18 = vmul.f32 -1.442695, %v2109_v17 }
 0x37b   :  { %v2144_v31 = vpop.xlane.xlu1 %2143 }
 0x37c   :  { %3019 = vpow2.f32 %v2608_v18  ;;  %v2145_v21 = vadd.f32 %v2144_v31, %v2025_v10 }
 0x37e   :  { %v2609_v42 = vmul.f32 -1.442695, %v2145_v21 }
 0x380   :  { %3021 = vpow2.f32 %v2609_v42 }
 0x381   :  { %v3016_v23 = vpop.eup %3015 }
 0x382   :  { %v1971_v24 = vadd.f32 1.0, %v3016_v23 }
 0x384   :  { %3023 = vrcp.f32 %v1971_v24 }
 0x385   :  { %v3018_v29 = vpop.eup %3017 }
 0x386   :  { %v2030_v25 = vadd.f32 1.0, %v3018_v29 }
 0x388   :  { %3025 = vrcp.f32 %v2030_v25 }
 0x389   :  { %v3020_v46 = vpop.eup %3019 }
 0x38a   :  { %v2113_v35 = vadd.f32 1.0, %v3020_v46 }
 0x38c   :  { %3027 = vrcp.f32 %v2113_v35 }
 0x38d   :  { %v3022_v4 = vpop.eup %3021 }
 0x38e   :  { %v2149_v45 = vadd.f32 1.0, %v3022_v4 }
 0x390   :  { %3029 = vrcp.f32 %v2149_v45 }
 0x391   :  { %v3024_v51 = vpop.eup %3023 }
 0x392   :  { %v1974_v52 = vmul.f32 %v3024_v51, %v1967_v39 }
 0x394   :  { %v1986_v50 = vmul.f32 %v1979_v8, %v1974_v52  ;;  %v1987_v58 = vmul.f32 %v1983_v48, %v1974_v52 }
 0x395   :  { %v3026_v54 = vpop.eup %3025 }
 0x396   :  { %v1990_v56 = vcombine.low %v1986_v50, %v1987_v58  ;;  %v2033_v59 = vmul.f32 %v3026_v54, %v2026_v12  ;;  %v2611_v50 = vld [vmem:[%s3597_s10] ss:$0 sm:$0xff]  ;;  %s3217_s10 = smov [#allocation16]  }
 0x397   :  { %s2396_s16 = sshll.u32 %s3217_s10, 4  ;;  %s2397_s16 = int_to_ptr.vmem [resolvable:$true] %s2396_s16 }
 0x398   :  { %v1997_v13 = vrot.slane %v1990_v56, %v1996_v2  ;;  %v2044_v9 = vmul.f32 %v2037_v53, %v2033_v59  ;;  %v2045_v33 = vmul.f32 %v2041_v3, %v2033_v59  ;;  %v3040_v56 = vld [vmem:[#allocation3 + $0x8] sm:$0xff]  ;;  %s3171_s17 = scalar_lea.vmem %s2397_s16, 512  ;;  %p3176_p3 = scmp.lt.s32.totalorder %s2397_s16, %s2397_s16 }
 0x399   :  { %v3028_v34 = vpop.eup %3027  ;;  %p3172_p2 = scmp.ne.s32.totalorder %s2397_s16, %s3171_s17  ;;  %p3177_p4 = scmp.lt.s32.totalorder %s3171_s17, %s3171_s17 }
 0x39a   :  { %v2004_v15 = vrot.slane %v1997_v13, %v1996_v2  ;;  %v2048_v60 = vcombine.low %v2044_v9, %v2045_v33  ;;  %v2116_v41 = vmul.f32 %v3028_v34, %v2109_v17 }
 0x39b   :  { %p3178_p5 = por %p3177_p4, %p3176_p3 }
 0x39c   :  { %v2055_v61 = vrot.slane %v2048_v60, %v1996_v2  ;;  %v2117_v36 = vmul.f32 %v2116_v41, %v1979_v8  ;;  %v2118_v0 = vmul.f32 %v2116_v41, %v1983_v48  ;;  %v2006_v27 = vadd.f32 %v2004_v15, %v1928_v40  ;;  %v3041_v60 = vld [vmem:[#allocation3 + $0x10] sm:$0xff] }
 0x39d   :  { %v3030_v1 = vpop.eup %3029  ;;  %p3179_p6 = pnand %p3178_p5, %p3172_p2 }
 0x39e   :  { %v2062_v20 = vrot.slane %v2055_v61, %v1996_v2  ;;  %v2121_v22 = vcombine.low %v2117_v36, %v2118_v0  ;;  %v2152_v5 = vmul.f32 %v3030_v1, %v2145_v21  ;;  %v3042_v36 = vld [vmem:[#allocation3 + $0x18] sm:$0xff] }
 0x3a0   :  { %v2064_v6 = vadd.f32 %v2062_v20, %v2006_v27  ;;  %v2128_v11 = vrot.slane %v2121_v22, %v1996_v2  ;;  %v2153_v39 = vmul.f32 %v2152_v5, %v2037_v53  ;;  %v2154_v10 = vmul.f32 %v2152_v5, %v2041_v3  ;;  %v3039_v3 = vld [vmem:[#allocation3] sm:$0xff] }
 0x3a2   :  { %v2607_v16 = vmul.f32 -1.442695, %v2064_v6  ;;  %v2135_v19 = vrot.slane %v2128_v11, %v1996_v2  ;;  %v2157_v12 = vcombine.low %v2153_v39, %v2154_v10 }
 0x3a4   :  { %3031 = vpow2.f32 %v2607_v16  ;;  %v2164_v14 = vrot.slane %v2157_v12, %v1996_v2  ;;  %v2137_v26 = vadd.f32 %v2135_v19, %v1928_v40 }
 0x3a6   :  { %v2171_v18 = vrot.slane %v2164_v14, %v1996_v2 }
 0x3a8   :  { %v2173_v17 = vadd.f32 %v2171_v18, %v2137_v26 }
 0x3aa   :  { %v2610_v31 = vmul.f32 -1.442695, %v2173_v17 }
 0x3ac   :  { %3033 = vpow2.f32 %v2610_v31 }
 0x3b1   :  { %v3032_v42 = vpop.eup %3031 }
 0x3b2   :  { %v2068_v23 = vadd.f32 1.0, %v3032_v42 }
 0x3b4   :  { %3035 = vrcp.f32 %v2068_v23 }
 0x3b9   :  { %v3034_v24 = vpop.eup %3033 }
 0x3ba   :  { %v2177_v29 = vadd.f32 1.0, %v3034_v24 }
 0x3bc   :  { %3037 = vrcp.f32 %v2177_v29 }
 0x3c1   :  { %v3036_v21 = vpop.eup %3035 }
 0x3c2   :  { %v2079_v25 = vrot.slane %v3036_v21, %v3314_v30  ;;  %v2075_v46 = vrot.slane %v3036_v21, %v3311_v28 }
 0x3c4   :  { %v2083_v57 = vmul.f32 %v2079_v25, %v3514_v44  ;;  %v2085_v32 = vmul.f32 %v2079_v25, %v3518_v47  ;;  %v2082_v35 = vmul.f32 %v2075_v46, %v3508_v7  ;;  %v2084_v38 = vmul.f32 %v2075_v46, %v3511_v62 }
 0x3c6   :  { %v2196_v4 = vpack.c.bf16 %v2085_v32, %v2083_v57  ;;  %v2195_v43 = vpack.c.bf16 %v2084_v38, %v2082_v35 }
 0x3c8   :  { %2366 = vmatprep.mubr.bf16.mxu0 %v2196_v4 }
 0x3c9   :  { %2367 = vmatmul.mubr.bf16.vlgmr.msra.gmra.mxu0 %v2195_v43  ;;  %v3038_v45 = vpop.eup %3037 }
 0x3ca   :  { %v2188_v8 = vrot.slane %v3038_v45, %v3314_v30  ;;  %v2184_v48 = vrot.slane %v3038_v45, %v3311_v28 }
 0x3cc   :  { %v2192_v51 = vmul.f32 %v2188_v8, %v3526_v55  ;;  %v2194_v52 = vmul.f32 %v2188_v8, %v3530_v49  ;;  %v2191_v44 = vmul.f32 %v2184_v48, %v3522_v37  ;;  %v2193_v47 = vmul.f32 %v2184_v48, %v3524_v63 }
 0x3ce   :  { %v2198_v7 = vpack.c.bf16 %v2194_v52, %v2192_v51  ;;  %v2197_v2 = vpack.c.bf16 %v2193_v47, %v2191_v44 }
 0x3d0   :  { %2374 = vmatprep.mubr.bf16.mxu0 %v2198_v7 }
 0x3d1   :  { %2375 = vmatmul.mubr.bf16.gmra.mxu0 %v2197_v2 }
 0x489   :  { %v2644_v62 = vpop.f32.mrf.mxu0 }
 0x48b   :  { %v2645_v30 = vpop.f32.mrf.mxu0 }
 0x48c   :  { %v2646_v58 = vadd.f32 %v2645_v30, %v2644_v62 }
 0x48d   :  { %v2647_v28 = vpop.f32.mrf.mxu0 }
 0x48e   :  { %v2369_v53 = vadd.f32 %v2646_v58, %v2611_v50 }
 0x48f   :  { %v2648_v55 = vpop.f32.mrf.mxu0 }
 0x490   :  { %v2383_v49 = vadd.f32 %v3039_v3, %v2369_v53  ;;  %v2649_v54 = vadd.f32 %v2648_v55, %v2647_v28 }
 0x491   :  { %v2650_v63 = vpop.f32.mrf.mxu0 }
 0x492   :  { %2387 = vst [vmem:[#allocation16] sm:$0xff] %v2383_v49  ;;  %v2372_v37 = vadd.f32 %v2649_v54, %v2611_v50 }
 0x493   :  { %v2651_v13 = vpop.f32.mrf.mxu0 }
 0x494   :  { %v2384_v59 = vadd.f32 %v3040_v56, %v2372_v37  ;;  %v2652_v9 = vadd.f32 %v2651_v13, %v2650_v63 }
 0x495   :  { %v2653_v33 = vpop.f32.mrf.mxu0 }
 0x496   :  { %2388 = vst [vmem:[#allocation16 + $0x8] sm:$0xff] %v2384_v59  ;;  %v2377_v34 = vadd.f32 %v2652_v9, %v2611_v50 }
 0x497   :  { %v2654_v15 = vpop.f32.mrf.mxu0 }
 0x498   :  { %v2385_v40 = vadd.f32 %v3041_v60, %v2377_v34  ;;  %v2655_v41 = vadd.f32 %v2654_v15, %v2653_v33 }
 0x49a   :  { %2389 = vst [vmem:[#allocation16 + $0x10] sm:$0xff] %v2385_v40  ;;  %v2380_v61 = vadd.f32 %v2655_v41, %v2611_v50 }
 0x49c   :  { %v2386_v0 = vadd.f32 %v3042_v36, %v2380_v61 }
 0x49e   :  { %2390 = vst [vmem:[#allocation16 + $0x18] sm:$0xff] %v2386_v0 }
 0x49f   :  { %3182 = shalt.err (!%p3179_p6)
}
 0x4a0   :  { %2402 = dma.vmem_to_hbm [thread:$0]  %s2397_s16, 512, %s3598_s11, [#allocation5], %s3205_s22, %s3205_s22, %s3206_s23  }
 0x4a1   :  { %3201 = dma.done.wait [#allocation5], 512  }
 0x4a2   :  { %3202 = vsyncadd [#allocation5], 4294966784 }
 0x4a3   :  { %2406 = vsyncpa [#allocation4], 1 }
 0x4a4   :  { %2407 = vsyncpa [#allocation8], 1 }
 0x4a5   :  { %2408 = vsyncpa [#allocation11], 1 }
 0x4a6   :  { %2409 = vsyncpa [#allocation15], 1 }
 0x4a7   :  { %2410 = vsyncpa [#allocation5], 1 }
 0x4a8   :  { %2411 = vsyncpa [#allocation6], 1 }

</bundles_post_ra>
